<compile_context>
chip_gen: v7x
topology: tpu7x:2x2x1
jax: 0.10.0
libtpu: 0.0.40
codegen_flags: <defaults>
</compile_context>

<pallas_src>
import functools

import jax
import jax.numpy as jnp
from jax.experimental import pallas as pl
from jax.experimental.pallas import tpu as pltpu


def _round_up(v, m):
    return ((v + m - 1) // m) * m


# Gate order [i, f, g, o]; the 0.5 on i/f/o folds sigmoid into a single tanh:
#   sigmoid(x) = 0.5 * tanh(0.5 * x) + 0.5
_GATE_SCALE = (0.5, 0.5, 1.0, 0.5)


# -----------------------------------------------------------------------------
# In-kernel helper: one LSTM layer, fully unrolled over time, operating on
# VALUES (list of T arrays of shape (B, In), f32) so inter-layer sequences
# never touch VMEM scratch.
#   wih : (In, 4H) bf16   (transposed vs PyTorch, gates pre-scaled, zero-padded)
#   whh : (H,  4H) bf16
#   bias: (1,  4H) f32    (b_ih + b_hh folded, gates pre-scaled)
# Returns the list of T hidden states (B, H) f32.
# -----------------------------------------------------------------------------
def _lstm_layer(xs, wih, whh, bias, H):
    T = len(xs)
    B = xs[0].shape[0]
    # Hoisted input projection: one (T*B, In) @ (In, 4H) matmul + bias, done once
    # outside the serial recurrence (B is a multiple of 8 -> tile-aligned rows).
    x_all = jnp.concatenate(xs, axis=0).astype(jnp.bfloat16)
    xw = jnp.dot(x_all, wih, preferred_element_type=jnp.float32) + bias
    h = jnp.zeros((B, H), jnp.float32)
    c = jnp.zeros((B, H), jnp.float32)
    ys = []
    for t in range(T):  # static, tiny T -> full unroll; carries stay in vregs
        # TODO(synk): pin whh in MXU weight staging (pltpu.matmul_push_rhs /
        # matmul_acc_lhs / matmul_pop) so the same RHS isn't re-pushed each step.
        z = xw[t * B:(t + 1) * B] + jnp.dot(
            h.astype(jnp.bfloat16), whh, preferred_element_type=jnp.float32)
        tz = jnp.tanh(z)                        # single full-width EUP push
        i_g = 0.5 * tz[:, 0 * H:1 * H] + 0.5    # == sigmoid of unscaled pre-act
        f_g = 0.5 * tz[:, 1 * H:2 * H] + 0.5
        g_g = tz[:, 2 * H:3 * H]
        o_g = 0.5 * tz[:, 3 * H:4 * H] + 0.5
        c = f_g * c + i_g * g_g
        h = o_g * jnp.tanh(c)
        ys.append(h)
        # TODO(synk): switch to lax.fori_loop(..., unroll=True) if H or T grows
        # enough for the fully-unrolled live ranges to spill the 64-vreg file.
    return ys


# -----------------------------------------------------------------------------
# Fused autoencoder kernel factory.
#   x_ref  : (T, Bp, in0_pad) f32
#   w_ref  : (R, Wmax) bf16   packed [wih_0, whh_0, wih_1, whh_1, ...]
#   b_ref  : (n_layers, Wmax) f32 packed biases
#   out_ref: (num_enc, Bp, h_dec) f32
# `offsets` are static Python ints (row offsets / sizes inside the packed slab).
# -----------------------------------------------------------------------------
def _make_autoencoder_kernel(num_enc, num_dec, T, offsets):
    def kernel(x_ref, w_ref, b_ref, out_ref):
        def layer_params(idx):
            o = offsets[idx]
            wih = w_ref[o["wih_r0"]:o["wih_r0"] + o["wih_rows"], :o["width"]]
            whh = w_ref[o["whh_r0"]:o["whh_r0"] + o["whh_rows"], :o["width"]]
            b = b_ref[idx:idx + 1, :o["width"]]
            return wih, whh, b, o["whh_rows"]

        # ---- encoder: stacked LSTM; keep each layer's last hidden state ----
        xs = [x_ref[t] for t in range(T)]
        h_stack = []
        for l in range(num_enc):
            wih, whh, b, H = layer_params(l)
            xs = _lstm_layer(xs, wih, whh, b, H)
            h_stack.append(xs[-1])

        # ---- decoder: stacked LSTM over the (num_enc, B, H) hidden stack ----
        xs = h_stack
        for l in range(num_dec):
            wih, whh, b, H = layer_params(num_enc + l)
            xs = _lstm_layer(xs, wih, whh, b, H)

        # Only the last decoder layer's sequence ever leaves the kernel.
        for t in range(num_enc):
            out_ref[t] = xs[t]

    return kernel


# -----------------------------------------------------------------------------
# Parameter construction (deterministic, PyTorch-style uniform(-k, k) init).
# -----------------------------------------------------------------------------
def init_lstm_params(key, input_size, hidden_size, num_layers):
    """Raw PyTorch-layout params per layer: (w_ih (4H,In), w_hh (4H,H), b_ih, b_hh)."""
    params = []
    k = 1.0 / float(hidden_size) ** 0.5
    for layer in range(num_layers):
        in_sz = input_size if layer == 0 else hidden_size
        key, k1, k2, k3, k4 = jax.random.split(key, 5)
        w_ih = jax.random.uniform(k1, (4 * hidden_size, in_sz), jnp.float32, -k, k)
        w_hh = jax.random.uniform(k2, (4 * hidden_size, hidden_size), jnp.float32, -k, k)
        b_ih = jax.random.uniform(k3, (4 * hidden_size,), jnp.float32, -k, k)
        b_hh = jax.random.uniform(k4, (4 * hidden_size,), jnp.float32, -k, k)
        params.append((w_ih, w_hh, b_ih, b_hh))
    return params, key


def _pad_layer(w_ih, w_hh, b_ih, b_hh, in_pad, h_pad):
    """Transpose for right-matmuls, fold biases, pre-scale i/f/o gates by 0.5
    (sigmoid -> tanh folding), zero-pad:
       * input rows           -> in_pad
       * each gate's columns  -> h_pad  (4*h_pad is a multiple of 128 lanes)
    Zero padding is inert: padded z = 0 -> tanh(0)=0 -> i=f=o=0.5, g=0, so
    padded c/h columns remain exactly 0 for every timestep."""
    H = w_hh.shape[1]
    scale = jnp.asarray(_GATE_SCALE, jnp.float32)[None, :, None]

    def prep(w):  # (rows, 4H) -> gate-scaled, per-gate zero-padded (rows, 4*h_pad)
        rows = w.shape[0]
        w = w.reshape(rows, 4, H) * scale
        w = jnp.pad(w, ((0, 0), (0, 0), (0, h_pad - H)))
        return w.reshape(rows, 4 * h_pad)

    wih_t = prep(w_ih.T)                                     # (In, 4*h_pad)
    wih_t = jnp.pad(wih_t, ((0, in_pad - wih_t.shape[0]), (0, 0)))
    whh_t = prep(w_hh.T)                                     # (H, 4*h_pad)
    whh_t = jnp.pad(whh_t, ((0, h_pad - H), (0, 0)))
    bias = prep((b_ih + b_hh).reshape(1, 4 * H))             # (1, 4*h_pad)
    return wih_t, whh_t, bias


def prepare_packed_params(enc_raw, dec_raw, input_size, hidden_size):
    """Pack every layer's (wih, whh) into ONE bf16 slab and every bias into ONE
    f32 slab, with 16-row-aligned static offsets for in-kernel slicing."""
    h_enc = _round_up(hidden_size, 32)   # 4*h_enc multiple of 128 (lane-dense gates)
    h_dec = _round_up(input_size, 32)    # decoder hidden size == input_size
    in0_pad = _round_up(input_size, 16)  # bf16 sublane tile = 16 -> aligned offsets
    wmax = max(4 * h_enc, 4 * h_dec)

    layers = []
    for i, p in enumerate(enc_raw):
        in_pad = in0_pad if i == 0 else h_enc
        layers.append(_pad_layer(*p, in_pad=in_pad, h_pad=h_enc) + (4 * h_enc,))
    for i, p in enumerate(dec_raw):
        in_pad = h_enc if i == 0 else h_dec
        layers.append(_pad_layer(*p, in_pad=in_pad, h_pad=h_dec) + (4 * h_dec,))

    blocks, biases, offsets = [], [], []
    r = 0
    for wih_t, whh_t, bias, width in layers:
        blocks.append(jnp.pad(wih_t, ((0, 0), (0, wmax - width))))
        blocks.append(jnp.pad(whh_t, ((0, 0), (0, wmax - width))))
        biases.append(jnp.pad(bias, ((0, 0), (0, wmax - width))))
        offsets.append(dict(
            wih_r0=r, wih_rows=int(wih_t.shape[0]),
            whh_r0=r + int(wih_t.shape[0]), whh_rows=int(whh_t.shape[0]),
            width=int(width)))
        r += int(wih_t.shape[0]) + int(whh_t.shape[0])

    w_packed = jnp.concatenate(blocks, axis=0).astype(jnp.bfloat16)  # (R, Wmax)
    b_packed = jnp.concatenate(biases, axis=0)                       # (n_layers, Wmax) f32
    return w_packed, b_packed, offsets, h_enc, h_dec, in0_pad


# -----------------------------------------------------------------------------
# Forward pass: one fused pallas_call for the whole autoencoder.
# -----------------------------------------------------------------------------
def autoencoder_forward(x, w_packed, b_packed, *, offsets, num_layers,
                        input_size, h_dec, in0_pad):
    """x: (T, B, input_size). Returns squeeze(decoder output (num_layers, B, input_size))."""
    T, B, F = x.shape
    Bp = _round_up(max(B, 8), 8)                              # sublane-dense batch
    x_p = jnp.pad(x, ((0, 0), (0, Bp - B), (0, in0_pad - F)))

    vmem = pl.BlockSpec(memory_space=pltpu.MemorySpace.VMEM)
    kernel = _make_autoencoder_kernel(num_layers, num_layers, T, offsets)

    y_pad = pl.pallas_call(
        kernel,
        out_shape=jax.ShapeDtypeStruct((num_layers, Bp, h_dec), jnp.float32),
        in_specs=[vmem, vmem, vmem],
        out_specs=vmem,
        # TODO(synk): at non-toy sizes, add a "parallel" batch grid axis (v7x has
        # 2 TensorCores) and stream the time axis with a grid + vmem_limit_bytes
        # (v7x: 64 MiB physical VMEM, v5e: 16 MiB scoped default).
    )(x_p, w_packed, b_packed)

    y = y_pad[:, :B, :input_size]                 # strip batch / gate padding
    return jnp.squeeze(y)                         # matches torch.squeeze(y)


# -----------------------------------------------------------------------------
# Pure-JAX reference (unpadded, unfused, full precision) for correctness.
# -----------------------------------------------------------------------------
def _lstm_ref(x_seq, w_ih, w_hh, b_ih, b_hh):
    T, B, _ = x_seq.shape
    H = w_hh.shape[1]
    hp = jax.lax.Precision.HIGHEST

    def step(carry, x_t):
        h, c = carry
        z = (jnp.dot(x_t, w_ih.T, precision=hp)
             + jnp.dot(h, w_hh.T, precision=hp) + b_ih + b_hh)
        i = jax.nn.sigmoid(z[:, :H])
        f = jax.nn.sigmoid(z[:, H:2 * H])
        g = jnp.tanh(z[:, 2 * H:3 * H])
        o = jax.nn.sigmoid(z[:, 3 * H:])
        c = f * c + i * g
        h = o * jnp.tanh(c)
        return (h, c), h

    init = (jnp.zeros((B, H), jnp.float32), jnp.zeros((B, H), jnp.float32))
    (h, _), ys = jax.lax.scan(step, init, x_seq)
    return ys, h


def autoencoder_ref(x, enc_raw, dec_raw):
    seq = x
    h_lasts = []
    for p in enc_raw:
        seq, h = _lstm_ref(seq, *p)
        h_lasts.append(h)
    seq = jnp.stack(h_lasts, axis=0)
    for p in dec_raw:
        seq, _ = _lstm_ref(seq, *p)
    return jnp.squeeze(seq)


if __name__ == "__main__":
    input_size, hidden_size, num_layers = 16, 32, 2
    seq_len, batch = 8, 4

    key = jax.random.PRNGKey(0)
    enc_raw, key = init_lstm_params(key, input_size, hidden_size, num_layers)
    dec_raw, key = init_lstm_params(key, hidden_size, input_size, num_layers)
    key, xk = jax.random.split(key)
    x = jax.random.normal(xk, (seq_len, batch, input_size), jnp.float32)

    (w_packed, b_packed, offsets,
     h_enc, h_dec, in0_pad) = prepare_packed_params(
        enc_raw, dec_raw, input_size, hidden_size)

    fwd = jax.jit(functools.partial(
        autoencoder_forward, offsets=offsets, num_layers=num_layers,
        input_size=input_size, h_dec=h_dec, in0_pad=in0_pad))
    out = fwd(x, w_packed, b_packed)
    jax.block_until_ready(out)

    assert out.shape == (num_layers, batch, input_size), out.shape
    assert bool(jnp.all(jnp.isfinite(out)))

    # Numerics check against a plain-JAX (unpadded, unfused, f32-HIGHEST) reference.
    # Kernel uses explicit bf16 MXU operands with f32 accumulation.
    ref = jax.jit(lambda xx: autoencoder_ref(xx, enc_raw, dec_raw))(x)
    err = float(jnp.max(jnp.abs(out - ref)))
    assert err < 1e-2, f"max |err| vs reference = {err}"

    print("KERNEL_OK")
</pallas_src>

<mosaic_0001>
module attributes {stable_mosaic.version = 11 : i64} {
  func.func @kernel(%arg0: memref<8x8x16xf32, #tpu.memory_space<vmem>>, %arg1: memref<240x128xbf16, #tpu.memory_space<vmem>>, %arg2: memref<4x128xf32, #tpu.memory_space<vmem>>, %arg3: memref<2x8x32xf32, #tpu.memory_space<vmem>>) attributes {dimension_semantics = [], scalar_prefetch = 0 : i64, scratch_operands = 0 : i64, tpu.core_type = #tpu.core_type<tc>} {
    %c0 = arith.constant 0 : index
    %c0_0 = arith.constant 0 : index
    %c0_1 = arith.constant 0 : index
    %0 = vector.load %arg0[%c0, %c0_0, %c0_1] : memref<8x8x16xf32, #tpu.memory_space<vmem>>, vector<1x8x16xf32>
    %1 = vector.shape_cast %0 : vector<1x8x16xf32> to vector<8x16xf32>
    %c1 = arith.constant 1 : index
    %c0_2 = arith.constant 0 : index
    %c0_3 = arith.constant 0 : index
    %2 = vector.load %arg0[%c1, %c0_2, %c0_3] : memref<8x8x16xf32, #tpu.memory_space<vmem>>, vector<1x8x16xf32>
    %3 = vector.shape_cast %2 : vector<1x8x16xf32> to vector<8x16xf32>
    %c2 = arith.constant 2 : index
    %c0_4 = arith.constant 0 : index
    %c0_5 = arith.constant 0 : index
    %4 = vector.load %arg0[%c2, %c0_4, %c0_5] : memref<8x8x16xf32, #tpu.memory_space<vmem>>, vector<1x8x16xf32>
    %5 = vector.shape_cast %4 : vector<1x8x16xf32> to vector<8x16xf32>
    %c3 = arith.constant 3 : index
    %c0_6 = arith.constant 0 : index
    %c0_7 = arith.constant 0 : index
    %6 = vector.load %arg0[%c3, %c0_6, %c0_7] : memref<8x8x16xf32, #tpu.memory_space<vmem>>, vector<1x8x16xf32>
    %7 = vector.shape_cast %6 : vector<1x8x16xf32> to vector<8x16xf32>
    %c4 = arith.constant 4 : index
    %c0_8 = arith.constant 0 : index
    %c0_9 = arith.constant 0 : index
    %8 = vector.load %arg0[%c4, %c0_8, %c0_9] : memref<8x8x16xf32, #tpu.memory_space<vmem>>, vector<1x8x16xf32>
    %9 = vector.shape_cast %8 : vector<1x8x16xf32> to vector<8x16xf32>
    %c5 = arith.constant 5 : index
    %c0_10 = arith.constant 0 : index
    %c0_11 = arith.constant 0 : index
    %10 = vector.load %arg0[%c5, %c0_10, %c0_11] : memref<8x8x16xf32, #tpu.memory_space<vmem>>, vector<1x8x16xf32>
    %11 = vector.shape_cast %10 : vector<1x8x16xf32> to vector<8x16xf32>
    %c6 = arith.constant 6 : index
    %c0_12 = arith.constant 0 : index
    %c0_13 = arith.constant 0 : index
    %12 = vector.load %arg0[%c6, %c0_12, %c0_13] : memref<8x8x16xf32, #tpu.memory_space<vmem>>, vector<1x8x16xf32>
    %13 = vector.shape_cast %12 : vector<1x8x16xf32> to vector<8x16xf32>
    %c7 = arith.constant 7 : index
    %c0_14 = arith.constant 0 : index
    %c0_15 = arith.constant 0 : index
    %14 = vector.load %arg0[%c7, %c0_14, %c0_15] : memref<8x8x16xf32, #tpu.memory_space<vmem>>, vector<1x8x16xf32>
    %15 = vector.shape_cast %14 : vector<1x8x16xf32> to vector<8x16xf32>
    %c0_16 = arith.constant 0 : index
    %c0_17 = arith.constant 0 : index
    %16 = vector.load %arg1[%c0_16, %c0_17] : memref<240x128xbf16, #tpu.memory_space<vmem>>, vector<16x128xbf16>
    %c16 = arith.constant 16 : index
    %c0_18 = arith.constant 0 : index
    %17 = vector.load %arg1[%c16, %c0_18] : memref<240x128xbf16, #tpu.memory_space<vmem>>, vector<32x128xbf16>
    %c0_19 = arith.constant 0 : index
    %c0_20 = arith.constant 0 : index
    %18 = vector.load %arg2[%c0_19, %c0_20] : memref<4x128xf32, #tpu.memory_space<vmem>>, vector<1x128xf32>
    %19 = tpu.concatenate %1, %3, %5, %7, %9, %11, %13, %15 in 0 : vector<8x16xf32>, vector<8x16xf32>, vector<8x16xf32>, vector<8x16xf32>, vector<8x16xf32>, vector<8x16xf32>, vector<8x16xf32>, vector<8x16xf32> -> vector<64x16xf32>
    %20 = arith.truncf %19 : vector<64x16xf32> to vector<64x16xbf16>
    %cst = arith.constant dense<0.000000e+00> : vector<64x128xf32>
    %21 = tpu.matmul %20, %16, %cst {dimension_numbers = #tpu.dot_dimension_numbers<[1], [0], [0], [1], [0, 0, 1, 1], [], []>} : vector<64x16xbf16>, vector<16x128xbf16>, vector<64x128xf32> -> vector<64x128xf32>
    %22 = vector.broadcast %18 : vector<1x128xf32> to vector<64x128xf32>
    %23 = arith.addf %21, %22 : vector<64x128xf32>
    %cst_21 = arith.constant 0.000000e+00 : f32
    %24 = vector.broadcast %cst_21 : f32 to vector<8x32xf32>
    %cst_22 = arith.constant 0.000000e+00 : f32
    %25 = vector.broadcast %cst_22 : f32 to vector<8x32xf32>
    %26 = vector.extract_strided_slice %23 {offsets = [0, 0], sizes = [8, 128], strides = [1, 1]} : vector<64x128xf32> to vector<8x128xf32>
    %27 = arith.truncf %24 : vector<8x32xf32> to vector<8x32xbf16>
    %cst_23 = arith.constant dense<0.000000e+00> : vector<8x128xf32>
    %28 = tpu.matmul %27, %17, %cst_23 {dimension_numbers = #tpu.dot_dimension_numbers<[1], [0], [0], [1], [0, 0, 1, 1], [], []>} : vector<8x32xbf16>, vector<32x128xbf16>, vector<8x128xf32> -> vector<8x128xf32>
    %29 = arith.addf %26, %28 : vector<8x128xf32>
    %30 = math.tanh %29 : vector<8x128xf32>
    %31 = vector.extract_strided_slice %30 {offsets = [0, 0], sizes = [8, 32], strides = [1, 1]} : vector<8x128xf32> to vector<8x32xf32>
    %cst_24 = arith.constant 5.000000e-01 : f32
    %32 = vector.broadcast %cst_24 : f32 to vector<8x32xf32>
    %33 = arith.mulf %32, %31 : vector<8x32xf32>
    %cst_25 = arith.constant 5.000000e-01 : f32
    %34 = vector.broadcast %cst_25 : f32 to vector<8x32xf32>
    %35 = arith.addf %33, %34 : vector<8x32xf32>
    %36 = vector.extract_strided_slice %30 {offsets = [0, 32], sizes = [8, 32], strides = [1, 1]} : vector<8x128xf32> to vector<8x32xf32>
    %cst_26 = arith.constant 5.000000e-01 : f32
    %37 = vector.broadcast %cst_26 : f32 to vector<8x32xf32>
    %38 = arith.mulf %37, %36 : vector<8x32xf32>
    %cst_27 = arith.constant 5.000000e-01 : f32
    %39 = vector.broadcast %cst_27 : f32 to vector<8x32xf32>
    %40 = arith.addf %38, %39 : vector<8x32xf32>
    %41 = vector.extract_strided_slice %30 {offsets = [0, 64], sizes = [8, 32], strides = [1, 1]} : vector<8x128xf32> to vector<8x32xf32>
    %42 = vector.extract_strided_slice %30 {offsets = [0, 96], sizes = [8, 32], strides = [1, 1]} : vector<8x128xf32> to vector<8x32xf32>
    %cst_28 = arith.constant 5.000000e-01 : f32
    %43 = vector.broadcast %cst_28 : f32 to vector<8x32xf32>
    %44 = arith.mulf %43, %42 : vector<8x32xf32>
    %cst_29 = arith.constant 5.000000e-01 : f32
    %45 = vector.broadcast %cst_29 : f32 to vector<8x32xf32>
    %46 = arith.addf %44, %45 : vector<8x32xf32>
    %47 = arith.mulf %40, %25 : vector<8x32xf32>
    %48 = arith.mulf %35, %41 : vector<8x32xf32>
    %49 = arith.addf %47, %48 : vector<8x32xf32>
    %50 = math.tanh %49 : vector<8x32xf32>
    %51 = arith.mulf %46, %50 : vector<8x32xf32>
    %52 = vector.extract_strided_slice %23 {offsets = [8, 0], sizes = [8, 128], strides = [1, 1]} : vector<64x128xf32> to vector<8x128xf32>
    %53 = arith.truncf %51 : vector<8x32xf32> to vector<8x32xbf16>
    %cst_30 = arith.constant dense<0.000000e+00> : vector<8x128xf32>
    %54 = tpu.matmul %53, %17, %cst_30 {dimension_numbers = #tpu.dot_dimension_numbers<[1], [0], [0], [1], [0, 0, 1, 1], [], []>} : vector<8x32xbf16>, vector<32x128xbf16>, vector<8x128xf32> -> vector<8x128xf32>
    %55 = arith.addf %52, %54 : vector<8x128xf32>
    %56 = math.tanh %55 : vector<8x128xf32>
    %57 = vector.extract_strided_slice %56 {offsets = [0, 0], sizes = [8, 32], strides = [1, 1]} : vector<8x128xf32> to vector<8x32xf32>
    %cst_31 = arith.constant 5.000000e-01 : f32
    %58 = vector.broadcast %cst_31 : f32 to vector<8x32xf32>
    %59 = arith.mulf %58, %57 : vector<8x32xf32>
    %cst_32 = arith.constant 5.000000e-01 : f32
    %60 = vector.broadcast %cst_32 : f32 to vector<8x32xf32>
    %61 = arith.addf %59, %60 : vector<8x32xf32>
    %62 = vector.extract_strided_slice %56 {offsets = [0, 32], sizes = [8, 32], strides = [1, 1]} : vector<8x128xf32> to vector<8x32xf32>
    %cst_33 = arith.constant 5.000000e-01 : f32
    %63 = vector.broadcast %cst_33 : f32 to vector<8x32xf32>
    %64 = arith.mulf %63, %62 : vector<8x32xf32>
    %cst_34 = arith.constant 5.000000e-01 : f32
    %65 = vector.broadcast %cst_34 : f32 to vector<8x32xf32>
    %66 = arith.addf %64, %65 : vector<8x32xf32>
    %67 = vector.extract_strided_slice %56 {offsets = [0, 64], sizes = [8, 32], strides = [1, 1]} : vector<8x128xf32> to vector<8x32xf32>
    %68 = vector.extract_strided_slice %56 {offsets = [0, 96], sizes = [8, 32], strides = [1, 1]} : vector<8x128xf32> to vector<8x32xf32>
    %cst_35 = arith.constant 5.000000e-01 : f32
    %69 = vector.broadcast %cst_35 : f32 to vector<8x32xf32>
    %70 = arith.mulf %69, %68 : vector<8x32xf32>
    %cst_36 = arith.constant 5.000000e-01 : f32
    %71 = vector.broadcast %cst_36 : f32 to vector<8x32xf32>
    %72 = arith.addf %70, %71 : vector<8x32xf32>
    %73 = arith.mulf %66, %49 : vector<8x32xf32>
    %74 = arith.mulf %61, %67 : vector<8x32xf32>
    %75 = arith.addf %73, %74 : vector<8x32xf32>
    %76 = math.tanh %75 : vector<8x32xf32>
    %77 = arith.mulf %72, %76 : vector<8x32xf32>
    %78 = vector.extract_strided_slice %23 {offsets = [16, 0], sizes = [8, 128], strides = [1, 1]} : vector<64x128xf32> to vector<8x128xf32>
    %79 = arith.truncf %77 : vector<8x32xf32> to vector<8x32xbf16>
    %cst_37 = arith.constant dense<0.000000e+00> : vector<8x128xf32>
    %80 = tpu.matmul %79, %17, %cst_37 {dimension_numbers = #tpu.dot_dimension_numbers<[1], [0], [0], [1], [0, 0, 1, 1], [], []>} : vector<8x32xbf16>, vector<32x128xbf16>, vector<8x128xf32> -> vector<8x128xf32>
    %81 = arith.addf %78, %80 : vector<8x128xf32>
    %82 = math.tanh %81 : vector<8x128xf32>
    %83 = vector.extract_strided_slice %82 {offsets = [0, 0], sizes = [8, 32], strides = [1, 1]} : vector<8x128xf32> to vector<8x32xf32>
    %cst_38 = arith.constant 5.000000e-01 : f32
    %84 = vector.broadcast %cst_38 : f32 to vector<8x32xf32>
    %85 = arith.mulf %84, %83 : vector<8x32xf32>
    %cst_39 = arith.constant 5.000000e-01 : f32
    %86 = vector.broadcast %cst_39 : f32 to vector<8x32xf32>
    %87 = arith.addf %85, %86 : vector<8x32xf32>
    %88 = vector.extract_strided_slice %82 {offsets = [0, 32], sizes = [8, 32], strides = [1, 1]} : vector<8x128xf32> to vector<8x32xf32>
    %cst_40 = arith.constant 5.000000e-01 : f32
    %89 = vector.broadcast %cst_40 : f32 to vector<8x32xf32>
    %90 = arith.mulf %89, %88 : vector<8x32xf32>
    %cst_41 = arith.constant 5.000000e-01 : f32
    %91 = vector.broadcast %cst_41 : f32 to vector<8x32xf32>
    %92 = arith.addf %90, %91 : vector<8x32xf32>
    %93 = vector.extract_strided_slice %82 {offsets = [0, 64], sizes = [8, 32], strides = [1, 1]} : vector<8x128xf32> to vector<8x32xf32>
    %94 = vector.extract_strided_slice %82 {offsets = [0, 96], sizes = [8, 32], strides = [1, 1]} : vector<8x128xf32> to vector<8x32xf32>
    %cst_42 = arith.constant 5.000000e-01 : f32
    %95 = vector.broadcast %cst_42 : f32 to vector<8x32xf32>
    %96 = arith.mulf %95, %94 : vector<8x32xf32>
    %cst_43 = arith.constant 5.000000e-01 : f32
    %97 = vector.broadcast %cst_43 : f32 to vector<8x32xf32>
    %98 = arith.addf %96, %97 : vector<8x32xf32>
    %99 = arith.mulf %92, %75 : vector<8x32xf32>
    %100 = arith.mulf %87, %93 : vector<8x32xf32>
    %101 = arith.addf %99, %100 : vector<8x32xf32>
    %102 = math.tanh %101 : vector<8x32xf32>
    %103 = arith.mulf %98, %102 : vector<8x32xf32>
    %104 = vector.extract_strided_slice %23 {offsets = [24, 0], sizes = [8, 128], strides = [1, 1]} : vector<64x128xf32> to vector<8x128xf32>
    %105 = arith.truncf %103 : vector<8x32xf32> to vector<8x32xbf16>
    %cst_44 = arith.constant dense<0.000000e+00> : vector<8x128xf32>
    %106 = tpu.matmul %105, %17, %cst_44 {dimension_numbers = #tpu.dot_dimension_numbers<[1], [0], [0], [1], [0, 0, 1, 1], [], []>} : vector<8x32xbf16>, vector<32x128xbf16>, vector<8x128xf32> -> vector<8x128xf32>
    %107 = arith.addf %104, %106 : vector<8x128xf32>
    %108 = math.tanh %107 : vector<8x128xf32>
    %109 = vector.extract_strided_slice %108 {offsets = [0, 0], sizes = [8, 32], strides = [1, 1]} : vector<8x128xf32> to vector<8x32xf32>
    %cst_45 = arith.constant 5.000000e-01 : f32
    %110 = vector.broadcast %cst_45 : f32 to vector<8x32xf32>
    %111 = arith.mulf %110, %109 : vector<8x32xf32>
    %cst_46 = arith.constant 5.000000e-01 : f32
    %112 = vector.broadcast %cst_46 : f32 to vector<8x32xf32>
    %113 = arith.addf %111, %112 : vector<8x32xf32>
    %114 = vector.extract_strided_slice %108 {offsets = [0, 32], sizes = [8, 32], strides = [1, 1]} : vector<8x128xf32> to vector<8x32xf32>
    %cst_47 = arith.constant 5.000000e-01 : f32
    %115 = vector.broadcast %cst_47 : f32 to vector<8x32xf32>
    %116 = arith.mulf %115, %114 : vector<8x32xf32>
    %cst_48 = arith.constant 5.000000e-01 : f32
    %117 = vector.broadcast %cst_48 : f32 to vector<8x32xf32>
    %118 = arith.addf %116, %117 : vector<8x32xf32>
    %119 = vector.extract_strided_slice %108 {offsets = [0, 64], sizes = [8, 32], strides = [1, 1]} : vector<8x128xf32> to vector<8x32xf32>
    %120 = vector.extract_strided_slice %108 {offsets = [0, 96], sizes = [8, 32], strides = [1, 1]} : vector<8x128xf32> to vector<8x32xf32>
    %cst_49 = arith.constant 5.000000e-01 : f32
    %121 = vector.broadcast %cst_49 : f32 to vector<8x32xf32>
    %122 = arith.mulf %121, %120 : vector<8x32xf32>
    %cst_50 = arith.constant 5.000000e-01 : f32
    %123 = vector.broadcast %cst_50 : f32 to vector<8x32xf32>
    %124 = arith.addf %122, %123 : vector<8x32xf32>
    %125 = arith.mulf %118, %101 : vector<8x32xf32>
    %126 = arith.mulf %113, %119 : vector<8x32xf32>
    %127 = arith.addf %125, %126 : vector<8x32xf32>
    %128 = math.tanh %127 : vector<8x32xf32>
    %129 = arith.mulf %124, %128 : vector<8x32xf32>
    %130 = vector.extract_strided_slice %23 {offsets = [32, 0], sizes = [8, 128], strides = [1, 1]} : vector<64x128xf32> to vector<8x128xf32>
    %131 = arith.truncf %129 : vector<8x32xf32> to vector<8x32xbf16>
    %cst_51 = arith.constant dense<0.000000e+00> : vector<8x128xf32>
    %132 = tpu.matmul %131, %17, %cst_51 {dimension_numbers = #tpu.dot_dimension_numbers<[1], [0], [0], [1], [0, 0, 1, 1], [], []>} : vector<8x32xbf16>, vector<32x128xbf16>, vector<8x128xf32> -> vector<8x128xf32>
    %133 = arith.addf %130, %132 : vector<8x128xf32>
    %134 = math.tanh %133 : vector<8x128xf32>
    %135 = vector.extract_strided_slice %134 {offsets = [0, 0], sizes = [8, 32], strides = [1, 1]} : vector<8x128xf32> to vector<8x32xf32>
    %cst_52 = arith.constant 5.000000e-01 : f32
    %136 = vector.broadcast %cst_52 : f32 to vector<8x32xf32>
    %137 = arith.mulf %136, %135 : vector<8x32xf32>
    %cst_53 = arith.constant 5.000000e-01 : f32
    %138 = vector.broadcast %cst_53 : f32 to vector<8x32xf32>
    %139 = arith.addf %137, %138 : vector<8x32xf32>
    %140 = vector.extract_strided_slice %134 {offsets = [0, 32], sizes = [8, 32], strides = [1, 1]} : vector<8x128xf32> to vector<8x32xf32>
    %cst_54 = arith.constant 5.000000e-01 : f32
    %141 = vector.broadcast %cst_54 : f32 to vector<8x32xf32>
    %142 = arith.mulf %141, %140 : vector<8x32xf32>
    %cst_55 = arith.constant 5.000000e-01 : f32
    %143 = vector.broadcast %cst_55 : f32 to vector<8x32xf32>
    %144 = arith.addf %142, %143 : vector<8x32xf32>
    %145 = vector.extract_strided_slice %134 {offsets = [0, 64], sizes = [8, 32], strides = [1, 1]} : vector<8x128xf32> to vector<8x32xf32>
    %146 = vector.extract_strided_slice %134 {offsets = [0, 96], sizes = [8, 32], strides = [1, 1]} : vector<8x128xf32> to vector<8x32xf32>
    %cst_56 = arith.constant 5.000000e-01 : f32
    %147 = vector.broadcast %cst_56 : f32 to vector<8x32xf32>
    %148 = arith.mulf %147, %146 : vector<8x32xf32>
    %cst_57 = arith.constant 5.000000e-01 : f32
    %149 = vector.broadcast %cst_57 : f32 to vector<8x32xf32>
    %150 = arith.addf %148, %149 : vector<8x32xf32>
    %151 = arith.mulf %144, %127 : vector<8x32xf32>
    %152 = arith.mulf %139, %145 : vector<8x32xf32>
    %153 = arith.addf %151, %152 : vector<8x32xf32>
    %154 = math.tanh %153 : vector<8x32xf32>
    %155 = arith.mulf %150, %154 : vector<8x32xf32>
    %156 = vector.extract_strided_slice %23 {offsets = [40, 0], sizes = [8, 128], strides = [1, 1]} : vector<64x128xf32> to vector<8x128xf32>
    %157 = arith.truncf %155 : vector<8x32xf32> to vector<8x32xbf16>
    %cst_58 = arith.constant dense<0.000000e+00> : vector<8x128xf32>
    %158 = tpu.matmul %157, %17, %cst_58 {dimension_numbers = #tpu.dot_dimension_numbers<[1], [0], [0], [1], [0, 0, 1, 1], [], []>} : vector<8x32xbf16>, vector<32x128xbf16>, vector<8x128xf32> -> vector<8x128xf32>
    %159 = arith.addf %156, %158 : vector<8x128xf32>
    %160 = math.tanh %159 : vector<8x128xf32>
    %161 = vector.extract_strided_slice %160 {offsets = [0, 0], sizes = [8, 32], strides = [1, 1]} : vector<8x128xf32> to vector<8x32xf32>
    %cst_59 = arith.constant 5.000000e-01 : f32
    %162 = vector.broadcast %cst_59 : f32 to vector<8x32xf32>
    %163 = arith.mulf %162, %161 : vector<8x32xf32>
    %cst_60 = arith.constant 5.000000e-01 : f32
    %164 = vector.broadcast %cst_60 : f32 to vector<8x32xf32>
    %165 = arith.addf %163, %164 : vector<8x32xf32>
    %166 = vector.extract_strided_slice %160 {offsets = [0, 32], sizes = [8, 32], strides = [1, 1]} : vector<8x128xf32> to vector<8x32xf32>
    %cst_61 = arith.constant 5.000000e-01 : f32
    %167 = vector.broadcast %cst_61 : f32 to vector<8x32xf32>
    %168 = arith.mulf %167, %166 : vector<8x32xf32>
    %cst_62 = arith.constant 5.000000e-01 : f32
    %169 = vector.broadcast %cst_62 : f32 to vector<8x32xf32>
    %170 = arith.addf %168, %169 : vector<8x32xf32>
    %171 = vector.extract_strided_slice %160 {offsets = [0, 64], sizes = [8, 32], strides = [1, 1]} : vector<8x128xf32> to vector<8x32xf32>
    %172 = vector.extract_strided_slice %160 {offsets = [0, 96], sizes = [8, 32], strides = [1, 1]} : vector<8x128xf32> to vector<8x32xf32>
    %cst_63 = arith.constant 5.000000e-01 : f32
    %173 = vector.broadcast %cst_63 : f32 to vector<8x32xf32>
    %174 = arith.mulf %173, %172 : vector<8x32xf32>
    %cst_64 = arith.constant 5.000000e-01 : f32
    %175 = vector.broadcast %cst_64 : f32 to vector<8x32xf32>
    %176 = arith.addf %174, %175 : vector<8x32xf32>
    %177 = arith.mulf %170, %153 : vector<8x32xf32>
    %178 = arith.mulf %165, %171 : vector<8x32xf32>
    %179 = arith.addf %177, %178 : vector<8x32xf32>
    %180 = math.tanh %179 : vector<8x32xf32>
    %181 = arith.mulf %176, %180 : vector<8x32xf32>
    %182 = vector.extract_strided_slice %23 {offsets = [48, 0], sizes = [8, 128], strides = [1, 1]} : vector<64x128xf32> to vector<8x128xf32>
    %183 = arith.truncf %181 : vector<8x32xf32> to vector<8x32xbf16>
    %cst_65 = arith.constant dense<0.000000e+00> : vector<8x128xf32>
    %184 = tpu.matmul %183, %17, %cst_65 {dimension_numbers = #tpu.dot_dimension_numbers<[1], [0], [0], [1], [0, 0, 1, 1], [], []>} : vector<8x32xbf16>, vector<32x128xbf16>, vector<8x128xf32> -> vector<8x128xf32>
    %185 = arith.addf %182, %184 : vector<8x128xf32>
    %186 = math.tanh %185 : vector<8x128xf32>
    %187 = vector.extract_strided_slice %186 {offsets = [0, 0], sizes = [8, 32], strides = [1, 1]} : vector<8x128xf32> to vector<8x32xf32>
    %cst_66 = arith.constant 5.000000e-01 : f32
    %188 = vector.broadcast %cst_66 : f32 to vector<8x32xf32>
    %189 = arith.mulf %188, %187 : vector<8x32xf32>
    %cst_67 = arith.constant 5.000000e-01 : f32
    %190 = vector.broadcast %cst_67 : f32 to vector<8x32xf32>
    %191 = arith.addf %189, %190 : vector<8x32xf32>
    %192 = vector.extract_strided_slice %186 {offsets = [0, 32], sizes = [8, 32], strides = [1, 1]} : vector<8x128xf32> to vector<8x32xf32>
    %cst_68 = arith.constant 5.000000e-01 : f32
    %193 = vector.broadcast %cst_68 : f32 to vector<8x32xf32>
    %194 = arith.mulf %193, %192 : vector<8x32xf32>
    %cst_69 = arith.constant 5.000000e-01 : f32
    %195 = vector.broadcast %cst_69 : f32 to vector<8x32xf32>
    %196 = arith.addf %194, %195 : vector<8x32xf32>
    %197 = vector.extract_strided_slice %186 {offsets = [0, 64], sizes = [8, 32], strides = [1, 1]} : vector<8x128xf32> to vector<8x32xf32>
    %198 = vector.extract_strided_slice %186 {offsets = [0, 96], sizes = [8, 32], strides = [1, 1]} : vector<8x128xf32> to vector<8x32xf32>
    %cst_70 = arith.constant 5.000000e-01 : f32
    %199 = vector.broadcast %cst_70 : f32 to vector<8x32xf32>
    %200 = arith.mulf %199, %198 : vector<8x32xf32>
    %cst_71 = arith.constant 5.000000e-01 : f32
    %201 = vector.broadcast %cst_71 : f32 to vector<8x32xf32>
    %202 = arith.addf %200, %201 : vector<8x32xf32>
    %203 = arith.mulf %196, %179 : vector<8x32xf32>
    %204 = arith.mulf %191, %197 : vector<8x32xf32>
    %205 = arith.addf %203, %204 : vector<8x32xf32>
    %206 = math.tanh %205 : vector<8x32xf32>
    %207 = arith.mulf %202, %206 : vector<8x32xf32>
    %208 = vector.extract_strided_slice %23 {offsets = [56, 0], sizes = [8, 128], strides = [1, 1]} : vector<64x128xf32> to vector<8x128xf32>
    %209 = arith.truncf %207 : vector<8x32xf32> to vector<8x32xbf16>
    %cst_72 = arith.constant dense<0.000000e+00> : vector<8x128xf32>
    %210 = tpu.matmul %209, %17, %cst_72 {dimension_numbers = #tpu.dot_dimension_numbers<[1], [0], [0], [1], [0, 0, 1, 1], [], []>} : vector<8x32xbf16>, vector<32x128xbf16>, vector<8x128xf32> -> vector<8x128xf32>
    %211 = arith.addf %208, %210 : vector<8x128xf32>
    %212 = math.tanh %211 : vector<8x128xf32>
    %213 = vector.extract_strided_slice %212 {offsets = [0, 0], sizes = [8, 32], strides = [1, 1]} : vector<8x128xf32> to vector<8x32xf32>
    %cst_73 = arith.constant 5.000000e-01 : f32
    %214 = vector.broadcast %cst_73 : f32 to vector<8x32xf32>
    %215 = arith.mulf %214, %213 : vector<8x32xf32>
    %cst_74 = arith.constant 5.000000e-01 : f32
    %216 = vector.broadcast %cst_74 : f32 to vector<8x32xf32>
    %217 = arith.addf %215, %216 : vector<8x32xf32>
    %218 = vector.extract_strided_slice %212 {offsets = [0, 32], sizes = [8, 32], strides = [1, 1]} : vector<8x128xf32> to vector<8x32xf32>
    %cst_75 = arith.constant 5.000000e-01 : f32
    %219 = vector.broadcast %cst_75 : f32 to vector<8x32xf32>
    %220 = arith.mulf %219, %218 : vector<8x32xf32>
    %cst_76 = arith.constant 5.000000e-01 : f32
    %221 = vector.broadcast %cst_76 : f32 to vector<8x32xf32>
    %222 = arith.addf %220, %221 : vector<8x32xf32>
    %223 = vector.extract_strided_slice %212 {offsets = [0, 64], sizes = [8, 32], strides = [1, 1]} : vector<8x128xf32> to vector<8x32xf32>
    %224 = vector.extract_strided_slice %212 {offsets = [0, 96], sizes = [8, 32], strides = [1, 1]} : vector<8x128xf32> to vector<8x32xf32>
    %cst_77 = arith.constant 5.000000e-01 : f32
    %225 = vector.broadcast %cst_77 : f32 to vector<8x32xf32>
    %226 = arith.mulf %225, %224 : vector<8x32xf32>
    %cst_78 = arith.constant 5.000000e-01 : f32
    %227 = vector.broadcast %cst_78 : f32 to vector<8x32xf32>
    %228 = arith.addf %226, %227 : vector<8x32xf32>
    %229 = arith.mulf %222, %205 : vector<8x32xf32>
    %230 = arith.mulf %217, %223 : vector<8x32xf32>
    %231 = arith.addf %229, %230 : vector<8x32xf32>
    %232 = math.tanh %231 : vector<8x32xf32>
    %233 = arith.mulf %228, %232 : vector<8x32xf32>
    %c48 = arith.constant 48 : index
    %c0_79 = arith.constant 0 : index
    %234 = vector.load %arg1[%c48, %c0_79] : memref<240x128xbf16, #tpu.memory_space<vmem>>, vector<32x128xbf16>
    %c80 = arith.constant 80 : index
    %c0_80 = arith.constant 0 : index
    %235 = vector.load %arg1[%c80, %c0_80] : memref<240x128xbf16, #tpu.memory_space<vmem>>, vector<32x128xbf16>
    %c1_81 = arith.constant 1 : index
    %c0_82 = arith.constant 0 : index
    %236 = vector.load %arg2[%c1_81, %c0_82] : memref<4x128xf32, #tpu.memory_space<vmem>>, vector<1x128xf32>
    %237 = tpu.concatenate %51, %77, %103, %129, %155, %181, %207, %233 in 0 : vector<8x32xf32>, vector<8x32xf32>, vector<8x32xf32>, vector<8x32xf32>, vector<8x32xf32>, vector<8x32xf32>, vector<8x32xf32>, vector<8x32xf32> -> vector<64x32xf32>
    %238 = arith.truncf %237 : vector<64x32xf32> to vector<64x32xbf16>
    %cst_83 = arith.constant dense<0.000000e+00> : vector<64x128xf32>
    %239 = tpu.matmul %238, %234, %cst_83 {dimension_numbers = #tpu.dot_dimension_numbers<[1], [0], [0], [1], [0, 0, 1, 1], [], []>} : vector<64x32xbf16>, vector<32x128xbf16>, vector<64x128xf32> -> vector<64x128xf32>
    %240 = vector.broadcast %236 : vector<1x128xf32> to vector<64x128xf32>
    %241 = arith.addf %239, %240 : vector<64x128xf32>
    %cst_84 = arith.constant 0.000000e+00 : f32
    %242 = vector.broadcast %cst_84 : f32 to vector<8x32xf32>
    %cst_85 = arith.constant 0.000000e+00 : f32
    %243 = vector.broadcast %cst_85 : f32 to vector<8x32xf32>
    %244 = vector.extract_strided_slice %241 {offsets = [0, 0], sizes = [8, 128], strides = [1, 1]} : vector<64x128xf32> to vector<8x128xf32>
    %245 = arith.truncf %242 : vector<8x32xf32> to vector<8x32xbf16>
    %cst_86 = arith.constant dense<0.000000e+00> : vector<8x128xf32>
    %246 = tpu.matmul %245, %235, %cst_86 {dimension_numbers = #tpu.dot_dimension_numbers<[1], [0], [0], [1], [0, 0, 1, 1], [], []>} : vector<8x32xbf16>, vector<32x128xbf16>, vector<8x128xf32> -> vector<8x128xf32>
    %247 = arith.addf %244, %246 : vector<8x128xf32>
    %248 = math.tanh %247 : vector<8x128xf32>
    %249 = vector.extract_strided_slice %248 {offsets = [0, 0], sizes = [8, 32], strides = [1, 1]} : vector<8x128xf32> to vector<8x32xf32>
    %cst_87 = arith.constant 5.000000e-01 : f32
    %250 = vector.broadcast %cst_87 : f32 to vector<8x32xf32>
    %251 = arith.mulf %250, %249 : vector<8x32xf32>
    %cst_88 = arith.constant 5.000000e-01 : f32
    %252 = vector.broadcast %cst_88 : f32 to vector<8x32xf32>
    %253 = arith.addf %251, %252 : vector<8x32xf32>
    %254 = vector.extract_strided_slice %248 {offsets = [0, 32], sizes = [8, 32], strides = [1, 1]} : vector<8x128xf32> to vector<8x32xf32>
    %cst_89 = arith.constant 5.000000e-01 : f32
    %255 = vector.broadcast %cst_89 : f32 to vector<8x32xf32>
    %256 = arith.mulf %255, %254 : vector<8x32xf32>
    %cst_90 = arith.constant 5.000000e-01 : f32
    %257 = vector.broadcast %cst_90 : f32 to vector<8x32xf32>
    %258 = arith.addf %256, %257 : vector<8x32xf32>
    %259 = vector.extract_strided_slice %248 {offsets = [0, 64], sizes = [8, 32], strides = [1, 1]} : vector<8x128xf32> to vector<8x32xf32>
    %260 = vector.extract_strided_slice %248 {offsets = [0, 96], sizes = [8, 32], strides = [1, 1]} : vector<8x128xf32> to vector<8x32xf32>
    %cst_91 = arith.constant 5.000000e-01 : f32
    %261 = vector.broadcast %cst_91 : f32 to vector<8x32xf32>
    %262 = arith.mulf %261, %260 : vector<8x32xf32>
    %cst_92 = arith.constant 5.000000e-01 : f32
    %263 = vector.broadcast %cst_92 : f32 to vector<8x32xf32>
    %264 = arith.addf %262, %263 : vector<8x32xf32>
    %265 = arith.mulf %258, %243 : vector<8x32xf32>
    %266 = arith.mulf %253, %259 : vector<8x32xf32>
    %267 = arith.addf %265, %266 : vector<8x32xf32>
    %268 = math.tanh %267 : vector<8x32xf32>
    %269 = arith.mulf %264, %268 : vector<8x32xf32>
    %270 = vector.extract_strided_slice %241 {offsets = [8, 0], sizes = [8, 128], strides = [1, 1]} : vector<64x128xf32> to vector<8x128xf32>
    %271 = arith.truncf %269 : vector<8x32xf32> to vector<8x32xbf16>
    %cst_93 = arith.constant dense<0.000000e+00> : vector<8x128xf32>
    %272 = tpu.matmul %271, %235, %cst_93 {dimension_numbers = #tpu.dot_dimension_numbers<[1], [0], [0], [1], [0, 0, 1, 1], [], []>} : vector<8x32xbf16>, vector<32x128xbf16>, vector<8x128xf32> -> vector<8x128xf32>
    %273 = arith.addf %270, %272 : vector<8x128xf32>
    %274 = math.tanh %273 : vector<8x128xf32>
    %275 = vector.extract_strided_slice %274 {offsets = [0, 0], sizes = [8, 32], strides = [1, 1]} : vector<8x128xf32> to vector<8x32xf32>
    %cst_94 = arith.constant 5.000000e-01 : f32
    %276 = vector.broadcast %cst_94 : f32 to vector<8x32xf32>
    %277 = arith.mulf %276, %275 : vector<8x32xf32>
    %cst_95 = arith.constant 5.000000e-01 : f32
    %278 = vector.broadcast %cst_95 : f32 to vector<8x32xf32>
    %279 = arith.addf %277, %278 : vector<8x32xf32>
    %280 = vector.extract_strided_slice %274 {offsets = [0, 32], sizes = [8, 32], strides = [1, 1]} : vector<8x128xf32> to vector<8x32xf32>
    %cst_96 = arith.constant 5.000000e-01 : f32
    %281 = vector.broadcast %cst_96 : f32 to vector<8x32xf32>
    %282 = arith.mulf %281, %280 : vector<8x32xf32>
    %cst_97 = arith.constant 5.000000e-01 : f32
    %283 = vector.broadcast %cst_97 : f32 to vector<8x32xf32>
    %284 = arith.addf %282, %283 : vector<8x32xf32>
    %285 = vector.extract_strided_slice %274 {offsets = [0, 64], sizes = [8, 32], strides = [1, 1]} : vector<8x128xf32> to vector<8x32xf32>
    %286 = vector.extract_strided_slice %274 {offsets = [0, 96], sizes = [8, 32], strides = [1, 1]} : vector<8x128xf32> to vector<8x32xf32>
    %cst_98 = arith.constant 5.000000e-01 : f32
    %287 = vector.broadcast %cst_98 : f32 to vector<8x32xf32>
    %288 = arith.mulf %287, %286 : vector<8x32xf32>
    %cst_99 = arith.constant 5.000000e-01 : f32
    %289 = vector.broadcast %cst_99 : f32 to vector<8x32xf32>
    %290 = arith.addf %288, %289 : vector<8x32xf32>
    %291 = arith.mulf %284, %267 : vector<8x32xf32>
    %292 = arith.mulf %279, %285 : vector<8x32xf32>
    %293 = arith.addf %291, %292 : vector<8x32xf32>
    %294 = math.tanh %293 : vector<8x32xf32>
    %295 = arith.mulf %290, %294 : vector<8x32xf32>
    %296 = vector.extract_strided_slice %241 {offsets = [16, 0], sizes = [8, 128], strides = [1, 1]} : vector<64x128xf32> to vector<8x128xf32>
    %297 = arith.truncf %295 : vector<8x32xf32> to vector<8x32xbf16>
    %cst_100 = arith.constant dense<0.000000e+00> : vector<8x128xf32>
    %298 = tpu.matmul %297, %235, %cst_100 {dimension_numbers = #tpu.dot_dimension_numbers<[1], [0], [0], [1], [0, 0, 1, 1], [], []>} : vector<8x32xbf16>, vector<32x128xbf16>, vector<8x128xf32> -> vector<8x128xf32>
    %299 = arith.addf %296, %298 : vector<8x128xf32>
    %300 = math.tanh %299 : vector<8x128xf32>
    %301 = vector.extract_strided_slice %300 {offsets = [0, 0], sizes = [8, 32], strides = [1, 1]} : vector<8x128xf32> to vector<8x32xf32>
    %cst_101 = arith.constant 5.000000e-01 : f32
    %302 = vector.broadcast %cst_101 : f32 to vector<8x32xf32>
    %303 = arith.mulf %302, %301 : vector<8x32xf32>
    %cst_102 = arith.constant 5.000000e-01 : f32
    %304 = vector.broadcast %cst_102 : f32 to vector<8x32xf32>
    %305 = arith.addf %303, %304 : vector<8x32xf32>
    %306 = vector.extract_strided_slice %300 {offsets = [0, 32], sizes = [8, 32], strides = [1, 1]} : vector<8x128xf32> to vector<8x32xf32>
    %cst_103 = arith.constant 5.000000e-01 : f32
    %307 = vector.broadcast %cst_103 : f32 to vector<8x32xf32>
    %308 = arith.mulf %307, %306 : vector<8x32xf32>
    %cst_104 = arith.constant 5.000000e-01 : f32
    %309 = vector.broadcast %cst_104 : f32 to vector<8x32xf32>
    %310 = arith.addf %308, %309 : vector<8x32xf32>
    %311 = vector.extract_strided_slice %300 {offsets = [0, 64], sizes = [8, 32], strides = [1, 1]} : vector<8x128xf32> to vector<8x32xf32>
    %312 = vector.extract_strided_slice %300 {offsets = [0, 96], sizes = [8, 32], strides = [1, 1]} : vector<8x128xf32> to vector<8x32xf32>
    %cst_105 = arith.constant 5.000000e-01 : f32
    %313 = vector.broadcast %cst_105 : f32 to vector<8x32xf32>
    %314 = arith.mulf %313, %312 : vector<8x32xf32>
    %cst_106 = arith.constant 5.000000e-01 : f32
    %315 = vector.broadcast %cst_106 : f32 to vector<8x32xf32>
    %316 = arith.addf %314, %315 : vector<8x32xf32>
    %317 = arith.mulf %310, %293 : vector<8x32xf32>
    %318 = arith.mulf %305, %311 : vector<8x32xf32>
    %319 = arith.addf %317, %318 : vector<8x32xf32>
    %320 = math.tanh %319 : vector<8x32xf32>
    %321 = arith.mulf %316, %320 : vector<8x32xf32>
    %322 = vector.extract_strided_slice %241 {offsets = [24, 0], sizes = [8, 128], strides = [1, 1]} : vector<64x128xf32> to vector<8x128xf32>
    %323 = arith.truncf %321 : vector<8x32xf32> to vector<8x32xbf16>
    %cst_107 = arith.constant dense<0.000000e+00> : vector<8x128xf32>
    %324 = tpu.matmul %323, %235, %cst_107 {dimension_numbers = #tpu.dot_dimension_numbers<[1], [0], [0], [1], [0, 0, 1, 1], [], []>} : vector<8x32xbf16>, vector<32x128xbf16>, vector<8x128xf32> -> vector<8x128xf32>
    %325 = arith.addf %322, %324 : vector<8x128xf32>
    %326 = math.tanh %325 : vector<8x128xf32>
    %327 = vector.extract_strided_slice %326 {offsets = [0, 0], sizes = [8, 32], strides = [1, 1]} : vector<8x128xf32> to vector<8x32xf32>
    %cst_108 = arith.constant 5.000000e-01 : f32
    %328 = vector.broadcast %cst_108 : f32 to vector<8x32xf32>
    %329 = arith.mulf %328, %327 : vector<8x32xf32>
    %cst_109 = arith.constant 5.000000e-01 : f32
    %330 = vector.broadcast %cst_109 : f32 to vector<8x32xf32>
    %331 = arith.addf %329, %330 : vector<8x32xf32>
    %332 = vector.extract_strided_slice %326 {offsets = [0, 32], sizes = [8, 32], strides = [1, 1]} : vector<8x128xf32> to vector<8x32xf32>
    %cst_110 = arith.constant 5.000000e-01 : f32
    %333 = vector.broadcast %cst_110 : f32 to vector<8x32xf32>
    %334 = arith.mulf %333, %332 : vector<8x32xf32>
    %cst_111 = arith.constant 5.000000e-01 : f32
    %335 = vector.broadcast %cst_111 : f32 to vector<8x32xf32>
    %336 = arith.addf %334, %335 : vector<8x32xf32>
    %337 = vector.extract_strided_slice %326 {offsets = [0, 64], sizes = [8, 32], strides = [1, 1]} : vector<8x128xf32> to vector<8x32xf32>
    %338 = vector.extract_strided_slice %326 {offsets = [0, 96], sizes = [8, 32], strides = [1, 1]} : vector<8x128xf32> to vector<8x32xf32>
    %cst_112 = arith.constant 5.000000e-01 : f32
    %339 = vector.broadcast %cst_112 : f32 to vector<8x32xf32>
    %340 = arith.mulf %339, %338 : vector<8x32xf32>
    %cst_113 = arith.constant 5.000000e-01 : f32
    %341 = vector.broadcast %cst_113 : f32 to vector<8x32xf32>
    %342 = arith.addf %340, %341 : vector<8x32xf32>
    %343 = arith.mulf %336, %319 : vector<8x32xf32>
    %344 = arith.mulf %331, %337 : vector<8x32xf32>
    %345 = arith.addf %343, %344 : vector<8x32xf32>
    %346 = math.tanh %345 : vector<8x32xf32>
    %347 = arith.mulf %342, %346 : vector<8x32xf32>
    %348 = vector.extract_strided_slice %241 {offsets = [32, 0], sizes = [8, 128], strides = [1, 1]} : vector<64x128xf32> to vector<8x128xf32>
    %349 = arith.truncf %347 : vector<8x32xf32> to vector<8x32xbf16>
    %cst_114 = arith.constant dense<0.000000e+00> : vector<8x128xf32>
    %350 = tpu.matmul %349, %235, %cst_114 {dimension_numbers = #tpu.dot_dimension_numbers<[1], [0], [0], [1], [0, 0, 1, 1], [], []>} : vector<8x32xbf16>, vector<32x128xbf16>, vector<8x128xf32> -> vector<8x128xf32>
    %351 = arith.addf %348, %350 : vector<8x128xf32>
    %352 = math.tanh %351 : vector<8x128xf32>
    %353 = vector.extract_strided_slice %352 {offsets = [0, 0], sizes = [8, 32], strides = [1, 1]} : vector<8x128xf32> to vector<8x32xf32>
    %cst_115 = arith.constant 5.000000e-01 : f32
    %354 = vector.broadcast %cst_115 : f32 to vector<8x32xf32>
    %355 = arith.mulf %354, %353 : vector<8x32xf32>
    %cst_116 = arith.constant 5.000000e-01 : f32
    %356 = vector.broadcast %cst_116 : f32 to vector<8x32xf32>
    %357 = arith.addf %355, %356 : vector<8x32xf32>
    %358 = vector.extract_strided_slice %352 {offsets = [0, 32], sizes = [8, 32], strides = [1, 1]} : vector<8x128xf32> to vector<8x32xf32>
    %cst_117 = arith.constant 5.000000e-01 : f32
    %359 = vector.broadcast %cst_117 : f32 to vector<8x32xf32>
    %360 = arith.mulf %359, %358 : vector<8x32xf32>
    %cst_118 = arith.constant 5.000000e-01 : f32
    %361 = vector.broadcast %cst_118 : f32 to vector<8x32xf32>
    %362 = arith.addf %360, %361 : vector<8x32xf32>
    %363 = vector.extract_strided_slice %352 {offsets = [0, 64], sizes = [8, 32], strides = [1, 1]} : vector<8x128xf32> to vector<8x32xf32>
    %364 = vector.extract_strided_slice %352 {offsets = [0, 96], sizes = [8, 32], strides = [1, 1]} : vector<8x128xf32> to vector<8x32xf32>
    %cst_119 = arith.constant 5.000000e-01 : f32
    %365 = vector.broadcast %cst_119 : f32 to vector<8x32xf32>
    %366 = arith.mulf %365, %364 : vector<8x32xf32>
    %cst_120 = arith.constant 5.000000e-01 : f32
    %367 = vector.broadcast %cst_120 : f32 to vector<8x32xf32>
    %368 = arith.addf %366, %367 : vector<8x32xf32>
    %369 = arith.mulf %362, %345 : vector<8x32xf32>
    %370 = arith.mulf %357, %363 : vector<8x32xf32>
    %371 = arith.addf %369, %370 : vector<8x32xf32>
    %372 = math.tanh %371 : vector<8x32xf32>
    %373 = arith.mulf %368, %372 : vector<8x32xf32>
    %374 = vector.extract_strided_slice %241 {offsets = [40, 0], sizes = [8, 128], strides = [1, 1]} : vector<64x128xf32> to vector<8x128xf32>
    %375 = arith.truncf %373 : vector<8x32xf32> to vector<8x32xbf16>
    %cst_121 = arith.constant dense<0.000000e+00> : vector<8x128xf32>
    %376 = tpu.matmul %375, %235, %cst_121 {dimension_numbers = #tpu.dot_dimension_numbers<[1], [0], [0], [1], [0, 0, 1, 1], [], []>} : vector<8x32xbf16>, vector<32x128xbf16>, vector<8x128xf32> -> vector<8x128xf32>
    %377 = arith.addf %374, %376 : vector<8x128xf32>
    %378 = math.tanh %377 : vector<8x128xf32>
    %379 = vector.extract_strided_slice %378 {offsets = [0, 0], sizes = [8, 32], strides = [1, 1]} : vector<8x128xf32> to vector<8x32xf32>
    %cst_122 = arith.constant 5.000000e-01 : f32
    %380 = vector.broadcast %cst_122 : f32 to vector<8x32xf32>
    %381 = arith.mulf %380, %379 : vector<8x32xf32>
    %cst_123 = arith.constant 5.000000e-01 : f32
    %382 = vector.broadcast %cst_123 : f32 to vector<8x32xf32>
    %383 = arith.addf %381, %382 : vector<8x32xf32>
    %384 = vector.extract_strided_slice %378 {offsets = [0, 32], sizes = [8, 32], strides = [1, 1]} : vector<8x128xf32> to vector<8x32xf32>
    %cst_124 = arith.constant 5.000000e-01 : f32
    %385 = vector.broadcast %cst_124 : f32 to vector<8x32xf32>
    %386 = arith.mulf %385, %384 : vector<8x32xf32>
    %cst_125 = arith.constant 5.000000e-01 : f32
    %387 = vector.broadcast %cst_125 : f32 to vector<8x32xf32>
    %388 = arith.addf %386, %387 : vector<8x32xf32>
    %389 = vector.extract_strided_slice %378 {offsets = [0, 64], sizes = [8, 32], strides = [1, 1]} : vector<8x128xf32> to vector<8x32xf32>
    %390 = vector.extract_strided_slice %378 {offsets = [0, 96], sizes = [8, 32], strides = [1, 1]} : vector<8x128xf32> to vector<8x32xf32>
    %cst_126 = arith.constant 5.000000e-01 : f32
    %391 = vector.broadcast %cst_126 : f32 to vector<8x32xf32>
    %392 = arith.mulf %391, %390 : vector<8x32xf32>
    %cst_127 = arith.constant 5.000000e-01 : f32
    %393 = vector.broadcast %cst_127 : f32 to vector<8x32xf32>
    %394 = arith.addf %392, %393 : vector<8x32xf32>
    %395 = arith.mulf %388, %371 : vector<8x32xf32>
    %396 = arith.mulf %383, %389 : vector<8x32xf32>
    %397 = arith.addf %395, %396 : vector<8x32xf32>
    %398 = math.tanh %397 : vector<8x32xf32>
    %399 = arith.mulf %394, %398 : vector<8x32xf32>
    %400 = vector.extract_strided_slice %241 {offsets = [48, 0], sizes = [8, 128], strides = [1, 1]} : vector<64x128xf32> to vector<8x128xf32>
    %401 = arith.truncf %399 : vector<8x32xf32> to vector<8x32xbf16>
    %cst_128 = arith.constant dense<0.000000e+00> : vector<8x128xf32>
    %402 = tpu.matmul %401, %235, %cst_128 {dimension_numbers = #tpu.dot_dimension_numbers<[1], [0], [0], [1], [0, 0, 1, 1], [], []>} : vector<8x32xbf16>, vector<32x128xbf16>, vector<8x128xf32> -> vector<8x128xf32>
    %403 = arith.addf %400, %402 : vector<8x128xf32>
    %404 = math.tanh %403 : vector<8x128xf32>
    %405 = vector.extract_strided_slice %404 {offsets = [0, 0], sizes = [8, 32], strides = [1, 1]} : vector<8x128xf32> to vector<8x32xf32>
    %cst_129 = arith.constant 5.000000e-01 : f32
    %406 = vector.broadcast %cst_129 : f32 to vector<8x32xf32>
    %407 = arith.mulf %406, %405 : vector<8x32xf32>
    %cst_130 = arith.constant 5.000000e-01 : f32
    %408 = vector.broadcast %cst_130 : f32 to vector<8x32xf32>
    %409 = arith.addf %407, %408 : vector<8x32xf32>
    %410 = vector.extract_strided_slice %404 {offsets = [0, 32], sizes = [8, 32], strides = [1, 1]} : vector<8x128xf32> to vector<8x32xf32>
    %cst_131 = arith.constant 5.000000e-01 : f32
    %411 = vector.broadcast %cst_131 : f32 to vector<8x32xf32>
    %412 = arith.mulf %411, %410 : vector<8x32xf32>
    %cst_132 = arith.constant 5.000000e-01 : f32
    %413 = vector.broadcast %cst_132 : f32 to vector<8x32xf32>
    %414 = arith.addf %412, %413 : vector<8x32xf32>
    %415 = vector.extract_strided_slice %404 {offsets = [0, 64], sizes = [8, 32], strides = [1, 1]} : vector<8x128xf32> to vector<8x32xf32>
    %416 = vector.extract_strided_slice %404 {offsets = [0, 96], sizes = [8, 32], strides = [1, 1]} : vector<8x128xf32> to vector<8x32xf32>
    %cst_133 = arith.constant 5.000000e-01 : f32
    %417 = vector.broadcast %cst_133 : f32 to vector<8x32xf32>
    %418 = arith.mulf %417, %416 : vector<8x32xf32>
    %cst_134 = arith.constant 5.000000e-01 : f32
    %419 = vector.broadcast %cst_134 : f32 to vector<8x32xf32>
    %420 = arith.addf %418, %419 : vector<8x32xf32>
    %421 = arith.mulf %414, %397 : vector<8x32xf32>
    %422 = arith.mulf %409, %415 : vector<8x32xf32>
    %423 = arith.addf %421, %422 : vector<8x32xf32>
    %424 = math.tanh %423 : vector<8x32xf32>
    %425 = arith.mulf %420, %424 : vector<8x32xf32>
    %426 = vector.extract_strided_slice %241 {offsets = [56, 0], sizes = [8, 128], strides = [1, 1]} : vector<64x128xf32> to vector<8x128xf32>
    %427 = arith.truncf %425 : vector<8x32xf32> to vector<8x32xbf16>
    %cst_135 = arith.constant dense<0.000000e+00> : vector<8x128xf32>
    %428 = tpu.matmul %427, %235, %cst_135 {dimension_numbers = #tpu.dot_dimension_numbers<[1], [0], [0], [1], [0, 0, 1, 1], [], []>} : vector<8x32xbf16>, vector<32x128xbf16>, vector<8x128xf32> -> vector<8x128xf32>
    %429 = arith.addf %426, %428 : vector<8x128xf32>
    %430 = math.tanh %429 : vector<8x128xf32>
    %431 = vector.extract_strided_slice %430 {offsets = [0, 0], sizes = [8, 32], strides = [1, 1]} : vector<8x128xf32> to vector<8x32xf32>
    %cst_136 = arith.constant 5.000000e-01 : f32
    %432 = vector.broadcast %cst_136 : f32 to vector<8x32xf32>
    %433 = arith.mulf %432, %431 : vector<8x32xf32>
    %cst_137 = arith.constant 5.000000e-01 : f32
    %434 = vector.broadcast %cst_137 : f32 to vector<8x32xf32>
    %435 = arith.addf %433, %434 : vector<8x32xf32>
    %436 = vector.extract_strided_slice %430 {offsets = [0, 32], sizes = [8, 32], strides = [1, 1]} : vector<8x128xf32> to vector<8x32xf32>
    %cst_138 = arith.constant 5.000000e-01 : f32
    %437 = vector.broadcast %cst_138 : f32 to vector<8x32xf32>
    %438 = arith.mulf %437, %436 : vector<8x32xf32>
    %cst_139 = arith.constant 5.000000e-01 : f32
    %439 = vector.broadcast %cst_139 : f32 to vector<8x32xf32>
    %440 = arith.addf %438, %439 : vector<8x32xf32>
    %441 = vector.extract_strided_slice %430 {offsets = [0, 64], sizes = [8, 32], strides = [1, 1]} : vector<8x128xf32> to vector<8x32xf32>
    %442 = vector.extract_strided_slice %430 {offsets = [0, 96], sizes = [8, 32], strides = [1, 1]} : vector<8x128xf32> to vector<8x32xf32>
    %cst_140 = arith.constant 5.000000e-01 : f32
    %443 = vector.broadcast %cst_140 : f32 to vector<8x32xf32>
    %444 = arith.mulf %443, %442 : vector<8x32xf32>
    %cst_141 = arith.constant 5.000000e-01 : f32
    %445 = vector.broadcast %cst_141 : f32 to vector<8x32xf32>
    %446 = arith.addf %444, %445 : vector<8x32xf32>
    %447 = arith.mulf %440, %423 : vector<8x32xf32>
    %448 = arith.mulf %435, %441 : vector<8x32xf32>
    %449 = arith.addf %447, %448 : vector<8x32xf32>
    %450 = math.tanh %449 : vector<8x32xf32>
    %451 = arith.mulf %446, %450 : vector<8x32xf32>
    %c112 = arith.constant 112 : index
    %c0_142 = arith.constant 0 : index
    %452 = vector.load %arg1[%c112, %c0_142] : memref<240x128xbf16, #tpu.memory_space<vmem>>, vector<32x128xbf16>
    %c144 = arith.constant 144 : index
    %c0_143 = arith.constant 0 : index
    %453 = vector.load %arg1[%c144, %c0_143] : memref<240x128xbf16, #tpu.memory_space<vmem>>, vector<32x128xbf16>
    %c2_144 = arith.constant 2 : index
    %c0_145 = arith.constant 0 : index
    %454 = vector.load %arg2[%c2_144, %c0_145] : memref<4x128xf32, #tpu.memory_space<vmem>>, vector<1x128xf32>
    %455 = tpu.concatenate %233, %451 in 0 : vector<8x32xf32>, vector<8x32xf32> -> vector<16x32xf32>
    %456 = arith.truncf %455 : vector<16x32xf32> to vector<16x32xbf16>
    %cst_146 = arith.constant dense<0.000000e+00> : vector<16x128xf32>
    %457 = tpu.matmul %456, %452, %cst_146 {dimension_numbers = #tpu.dot_dimension_numbers<[1], [0], [0], [1], [0, 0, 1, 1], [], []>} : vector<16x32xbf16>, vector<32x128xbf16>, vector<16x128xf32> -> vector<16x128xf32>
    %458 = vector.broadcast %454 : vector<1x128xf32> to vector<16x128xf32>
    %459 = arith.addf %457, %458 : vector<16x128xf32>
    %cst_147 = arith.constant 0.000000e+00 : f32
    %460 = vector.broadcast %cst_147 : f32 to vector<8x32xf32>
    %cst_148 = arith.constant 0.000000e+00 : f32
    %461 = vector.broadcast %cst_148 : f32 to vector<8x32xf32>
    %462 = vector.extract_strided_slice %459 {offsets = [0, 0], sizes = [8, 128], strides = [1, 1]} : vector<16x128xf32> to vector<8x128xf32>
    %463 = arith.truncf %460 : vector<8x32xf32> to vector<8x32xbf16>
    %cst_149 = arith.constant dense<0.000000e+00> : vector<8x128xf32>
    %464 = tpu.matmul %463, %453, %cst_149 {dimension_numbers = #tpu.dot_dimension_numbers<[1], [0], [0], [1], [0, 0, 1, 1], [], []>} : vector<8x32xbf16>, vector<32x128xbf16>, vector<8x128xf32> -> vector<8x128xf32>
    %465 = arith.addf %462, %464 : vector<8x128xf32>
    %466 = math.tanh %465 : vector<8x128xf32>
    %467 = vector.extract_strided_slice %466 {offsets = [0, 0], sizes = [8, 32], strides = [1, 1]} : vector<8x128xf32> to vector<8x32xf32>
    %cst_150 = arith.constant 5.000000e-01 : f32
    %468 = vector.broadcast %cst_150 : f32 to vector<8x32xf32>
    %469 = arith.mulf %468, %467 : vector<8x32xf32>
    %cst_151 = arith.constant 5.000000e-01 : f32
    %470 = vector.broadcast %cst_151 : f32 to vector<8x32xf32>
    %471 = arith.addf %469, %470 : vector<8x32xf32>
    %472 = vector.extract_strided_slice %466 {offsets = [0, 32], sizes = [8, 32], strides = [1, 1]} : vector<8x128xf32> to vector<8x32xf32>
    %cst_152 = arith.constant 5.000000e-01 : f32
    %473 = vector.broadcast %cst_152 : f32 to vector<8x32xf32>
    %474 = arith.mulf %473, %472 : vector<8x32xf32>
    %cst_153 = arith.constant 5.000000e-01 : f32
    %475 = vector.broadcast %cst_153 : f32 to vector<8x32xf32>
    %476 = arith.addf %474, %475 : vector<8x32xf32>
    %477 = vector.extract_strided_slice %466 {offsets = [0, 64], sizes = [8, 32], strides = [1, 1]} : vector<8x128xf32> to vector<8x32xf32>
    %478 = vector.extract_strided_slice %466 {offsets = [0, 96], sizes = [8, 32], strides = [1, 1]} : vector<8x128xf32> to vector<8x32xf32>
    %cst_154 = arith.constant 5.000000e-01 : f32
    %479 = vector.broadcast %cst_154 : f32 to vector<8x32xf32>
    %480 = arith.mulf %479, %478 : vector<8x32xf32>
    %cst_155 = arith.constant 5.000000e-01 : f32
    %481 = vector.broadcast %cst_155 : f32 to vector<8x32xf32>
    %482 = arith.addf %480, %481 : vector<8x32xf32>
    %483 = arith.mulf %476, %461 : vector<8x32xf32>
    %484 = arith.mulf %471, %477 : vector<8x32xf32>
    %485 = arith.addf %483, %484 : vector<8x32xf32>
    %486 = math.tanh %485 : vector<8x32xf32>
    %487 = arith.mulf %482, %486 : vector<8x32xf32>
    %488 = vector.extract_strided_slice %459 {offsets = [8, 0], sizes = [8, 128], strides = [1, 1]} : vector<16x128xf32> to vector<8x128xf32>
    %489 = arith.truncf %487 : vector<8x32xf32> to vector<8x32xbf16>
    %cst_156 = arith.constant dense<0.000000e+00> : vector<8x128xf32>
    %490 = tpu.matmul %489, %453, %cst_156 {dimension_numbers = #tpu.dot_dimension_numbers<[1], [0], [0], [1], [0, 0, 1, 1], [], []>} : vector<8x32xbf16>, vector<32x128xbf16>, vector<8x128xf32> -> vector<8x128xf32>
    %491 = arith.addf %488, %490 : vector<8x128xf32>
    %492 = math.tanh %491 : vector<8x128xf32>
    %493 = vector.extract_strided_slice %492 {offsets = [0, 0], sizes = [8, 32], strides = [1, 1]} : vector<8x128xf32> to vector<8x32xf32>
    %cst_157 = arith.constant 5.000000e-01 : f32
    %494 = vector.broadcast %cst_157 : f32 to vector<8x32xf32>
    %495 = arith.mulf %494, %493 : vector<8x32xf32>
    %cst_158 = arith.constant 5.000000e-01 : f32
    %496 = vector.broadcast %cst_158 : f32 to vector<8x32xf32>
    %497 = arith.addf %495, %496 : vector<8x32xf32>
    %498 = vector.extract_strided_slice %492 {offsets = [0, 32], sizes = [8, 32], strides = [1, 1]} : vector<8x128xf32> to vector<8x32xf32>
    %cst_159 = arith.constant 5.000000e-01 : f32
    %499 = vector.broadcast %cst_159 : f32 to vector<8x32xf32>
    %500 = arith.mulf %499, %498 : vector<8x32xf32>
    %cst_160 = arith.constant 5.000000e-01 : f32
    %501 = vector.broadcast %cst_160 : f32 to vector<8x32xf32>
    %502 = arith.addf %500, %501 : vector<8x32xf32>
    %503 = vector.extract_strided_slice %492 {offsets = [0, 64], sizes = [8, 32], strides = [1, 1]} : vector<8x128xf32> to vector<8x32xf32>
    %504 = vector.extract_strided_slice %492 {offsets = [0, 96], sizes = [8, 32], strides = [1, 1]} : vector<8x128xf32> to vector<8x32xf32>
    %cst_161 = arith.constant 5.000000e-01 : f32
    %505 = vector.broadcast %cst_161 : f32 to vector<8x32xf32>
    %506 = arith.mulf %505, %504 : vector<8x32xf32>
    %cst_162 = arith.constant 5.000000e-01 : f32
    %507 = vector.broadcast %cst_162 : f32 to vector<8x32xf32>
    %508 = arith.addf %506, %507 : vector<8x32xf32>
    %509 = arith.mulf %502, %485 : vector<8x32xf32>
    %510 = arith.mulf %497, %503 : vector<8x32xf32>
    %511 = arith.addf %509, %510 : vector<8x32xf32>
    %512 = math.tanh %511 : vector<8x32xf32>
    %513 = arith.mulf %508, %512 : vector<8x32xf32>
    %c176 = arith.constant 176 : index
    %c0_163 = arith.constant 0 : index
    %514 = vector.load %arg1[%c176, %c0_163] : memref<240x128xbf16, #tpu.memory_space<vmem>>, vector<32x128xbf16>
    %c208 = arith.constant 208 : index
    %c0_164 = arith.constant 0 : index
    %515 = vector.load %arg1[%c208, %c0_164] : memref<240x128xbf16, #tpu.memory_space<vmem>>, vector<32x128xbf16>
    %c3_165 = arith.constant 3 : index
    %c0_166 = arith.constant 0 : index
    %516 = vector.load %arg2[%c3_165, %c0_166] : memref<4x128xf32, #tpu.memory_space<vmem>>, vector<1x128xf32>
    %517 = tpu.concatenate %487, %513 in 0 : vector<8x32xf32>, vector<8x32xf32> -> vector<16x32xf32>
    %518 = arith.truncf %517 : vector<16x32xf32> to vector<16x32xbf16>
    %cst_167 = arith.constant dense<0.000000e+00> : vector<16x128xf32>
    %519 = tpu.matmul %518, %514, %cst_167 {dimension_numbers = #tpu.dot_dimension_numbers<[1], [0], [0], [1], [0, 0, 1, 1], [], []>} : vector<16x32xbf16>, vector<32x128xbf16>, vector<16x128xf32> -> vector<16x128xf32>
    %520 = vector.broadcast %516 : vector<1x128xf32> to vector<16x128xf32>
    %521 = arith.addf %519, %520 : vector<16x128xf32>
    %cst_168 = arith.constant 0.000000e+00 : f32
    %522 = vector.broadcast %cst_168 : f32 to vector<8x32xf32>
    %cst_169 = arith.constant 0.000000e+00 : f32
    %523 = vector.broadcast %cst_169 : f32 to vector<8x32xf32>
    %524 = vector.extract_strided_slice %521 {offsets = [0, 0], sizes = [8, 128], strides = [1, 1]} : vector<16x128xf32> to vector<8x128xf32>
    %525 = arith.truncf %522 : vector<8x32xf32> to vector<8x32xbf16>
    %cst_170 = arith.constant dense<0.000000e+00> : vector<8x128xf32>
    %526 = tpu.matmul %525, %515, %cst_170 {dimension_numbers = #tpu.dot_dimension_numbers<[1], [0], [0], [1], [0, 0, 1, 1], [], []>} : vector<8x32xbf16>, vector<32x128xbf16>, vector<8x128xf32> -> vector<8x128xf32>
    %527 = arith.addf %524, %526 : vector<8x128xf32>
    %528 = math.tanh %527 : vector<8x128xf32>
    %529 = vector.extract_strided_slice %528 {offsets = [0, 0], sizes = [8, 32], strides = [1, 1]} : vector<8x128xf32> to vector<8x32xf32>
    %cst_171 = arith.constant 5.000000e-01 : f32
    %530 = vector.broadcast %cst_171 : f32 to vector<8x32xf32>
    %531 = arith.mulf %530, %529 : vector<8x32xf32>
    %cst_172 = arith.constant 5.000000e-01 : f32
    %532 = vector.broadcast %cst_172 : f32 to vector<8x32xf32>
    %533 = arith.addf %531, %532 : vector<8x32xf32>
    %534 = vector.extract_strided_slice %528 {offsets = [0, 32], sizes = [8, 32], strides = [1, 1]} : vector<8x128xf32> to vector<8x32xf32>
    %cst_173 = arith.constant 5.000000e-01 : f32
    %535 = vector.broadcast %cst_173 : f32 to vector<8x32xf32>
    %536 = arith.mulf %535, %534 : vector<8x32xf32>
    %cst_174 = arith.constant 5.000000e-01 : f32
    %537 = vector.broadcast %cst_174 : f32 to vector<8x32xf32>
    %538 = arith.addf %536, %537 : vector<8x32xf32>
    %539 = vector.extract_strided_slice %528 {offsets = [0, 64], sizes = [8, 32], strides = [1, 1]} : vector<8x128xf32> to vector<8x32xf32>
    %540 = vector.extract_strided_slice %528 {offsets = [0, 96], sizes = [8, 32], strides = [1, 1]} : vector<8x128xf32> to vector<8x32xf32>
    %cst_175 = arith.constant 5.000000e-01 : f32
    %541 = vector.broadcast %cst_175 : f32 to vector<8x32xf32>
    %542 = arith.mulf %541, %540 : vector<8x32xf32>
    %cst_176 = arith.constant 5.000000e-01 : f32
    %543 = vector.broadcast %cst_176 : f32 to vector<8x32xf32>
    %544 = arith.addf %542, %543 : vector<8x32xf32>
    %545 = arith.mulf %538, %523 : vector<8x32xf32>
    %546 = arith.mulf %533, %539 : vector<8x32xf32>
    %547 = arith.addf %545, %546 : vector<8x32xf32>
    %548 = math.tanh %547 : vector<8x32xf32>
    %549 = arith.mulf %544, %548 : vector<8x32xf32>
    %550 = vector.extract_strided_slice %521 {offsets = [8, 0], sizes = [8, 128], strides = [1, 1]} : vector<16x128xf32> to vector<8x128xf32>
    %551 = arith.truncf %549 : vector<8x32xf32> to vector<8x32xbf16>
    %cst_177 = arith.constant dense<0.000000e+00> : vector<8x128xf32>
    %552 = tpu.matmul %551, %515, %cst_177 {dimension_numbers = #tpu.dot_dimension_numbers<[1], [0], [0], [1], [0, 0, 1, 1], [], []>} : vector<8x32xbf16>, vector<32x128xbf16>, vector<8x128xf32> -> vector<8x128xf32>
    %553 = arith.addf %550, %552 : vector<8x128xf32>
    %554 = math.tanh %553 : vector<8x128xf32>
    %555 = vector.extract_strided_slice %554 {offsets = [0, 0], sizes = [8, 32], strides = [1, 1]} : vector<8x128xf32> to vector<8x32xf32>
    %cst_178 = arith.constant 5.000000e-01 : f32
    %556 = vector.broadcast %cst_178 : f32 to vector<8x32xf32>
    %557 = arith.mulf %556, %555 : vector<8x32xf32>
    %cst_179 = arith.constant 5.000000e-01 : f32
    %558 = vector.broadcast %cst_179 : f32 to vector<8x32xf32>
    %559 = arith.addf %557, %558 : vector<8x32xf32>
    %560 = vector.extract_strided_slice %554 {offsets = [0, 32], sizes = [8, 32], strides = [1, 1]} : vector<8x128xf32> to vector<8x32xf32>
    %cst_180 = arith.constant 5.000000e-01 : f32
    %561 = vector.broadcast %cst_180 : f32 to vector<8x32xf32>
    %562 = arith.mulf %561, %560 : vector<8x32xf32>
    %cst_181 = arith.constant 5.000000e-01 : f32
    %563 = vector.broadcast %cst_181 : f32 to vector<8x32xf32>
    %564 = arith.addf %562, %563 : vector<8x32xf32>
    %565 = vector.extract_strided_slice %554 {offsets = [0, 64], sizes = [8, 32], strides = [1, 1]} : vector<8x128xf32> to vector<8x32xf32>
    %566 = vector.extract_strided_slice %554 {offsets = [0, 96], sizes = [8, 32], strides = [1, 1]} : vector<8x128xf32> to vector<8x32xf32>
    %cst_182 = arith.constant 5.000000e-01 : f32
    %567 = vector.broadcast %cst_182 : f32 to vector<8x32xf32>
    %568 = arith.mulf %567, %566 : vector<8x32xf32>
    %cst_183 = arith.constant 5.000000e-01 : f32
    %569 = vector.broadcast %cst_183 : f32 to vector<8x32xf32>
    %570 = arith.addf %568, %569 : vector<8x32xf32>
    %571 = arith.mulf %564, %547 : vector<8x32xf32>
    %572 = arith.mulf %559, %565 : vector<8x32xf32>
    %573 = arith.addf %571, %572 : vector<8x32xf32>
    %574 = math.tanh %573 : vector<8x32xf32>
    %575 = arith.mulf %570, %574 : vector<8x32xf32>
    %c0_184 = arith.constant 0 : index
    %c0_185 = arith.constant 0 : index
    %c0_186 = arith.constant 0 : index
    %576 = vector.load %arg3[%c0_184, %c0_185, %c0_186] : memref<2x8x32xf32, #tpu.memory_space<vmem>>, vector<1x8x32xf32>
    %577 = vector.shape_cast %576 : vector<1x8x32xf32> to vector<8x32xf32>
    %578 = vector.shape_cast %549 : vector<8x32xf32> to vector<1x8x32xf32>
    tpu.vector_store %arg3[%c0_184, %c0_185, %c0_186], %578 {strides = array<i32>} : memref<2x8x32xf32, #tpu.memory_space<vmem>>, vector<1x8x32xf32>,
    %c1_187 = arith.constant 1 : index
    %c0_188 = arith.constant 0 : index
    %c0_189 = arith.constant 0 : index
    %579 = vector.load %arg3[%c1_187, %c0_188, %c0_189] : memref<2x8x32xf32, #tpu.memory_space<vmem>>, vector<1x8x32xf32>
    %580 = vector.shape_cast %579 : vector<1x8x32xf32> to vector<8x32xf32>
    %581 = vector.shape_cast %575 : vector<8x32xf32> to vector<1x8x32xf32>
    tpu.vector_store %arg3[%c1_187, %c0_188, %c0_189], %581 {strides = array<i32>} : memref<2x8x32xf32, #tpu.memory_space<vmem>>, vector<1x8x32xf32>,
    return
  }
}

</mosaic_0001>

<bundles_post_ra>
// kernel: autoencoder_forward.1
= control target key start
LH: loop header
LB: loop body
LE: loop exit
PB: predicated region body
PF: predicated region fallthrough
CT: control target
= control target key end

     0   :  { %8 = vsyncpa [#allocation3], 0  ;;  %s2261_s12 = smov [#allocation2]   ;;  %s2687_s0 = inlined_call_operand.vmem [shape: f32[8,8,16], index: 0, kind: input, shape index: {}]   ;;  %s2688_s1 = inlined_call_operand.hbm [shape: bf16[240,128], index: 1, kind: input, shape index: {}]   ;;  %s2689_s2 = inlined_call_operand.vmem [shape: f32[4,128], index: 2, kind: input, shape index: {}]   ;;  %s2690_s3 = inlined_call_operand.vmem [shape: f32[2,8,32], index: 3, kind: output, shape index: {}]  }
   0x1   :  { %s16_s13 = sshll.u32 %s2261_s12, 4  ;;  %s2237_s16 = scalar_lea.hbm %s2688_s1, 1920  ;;  %s17_s13 = int_to_ptr.vmem [resolvable:$true] %s16_s13 }
   0x2   :  { %p2238_p0 = scmp.ne.s32.totalorder %s2688_s1, %s2237_s16  ;;  %p2241_p1 = scmp.lt.u32.totalorder %s2237_s16, %s2688_s1 }
   0x4   :  { %p2243_p2 = pnand %p2241_p1, %p2238_p0 }
   0x6   :  { %2246 = shalt.err (!%p2243_p2)
}
   0x7   :  { %s2247_s21 = scalar_lea.vmem %s17_s13, 1920  ;;  %p2252_p4 = scmp.lt.s32.totalorder %s17_s13, %s17_s13 }
   0x8   :  { %p2248_p3 = scmp.ne.s32.totalorder %s17_s13, %s2247_s21  ;;  %p2253_p5 = scmp.lt.s32.totalorder %s2247_s21, %s2247_s21 }
   0xa   :  { %p2254_p6 = por %p2253_p5, %p2252_p4 }
   0xc   :  { %p2255_p7 = pnand %p2254_p6, %p2248_p3 }
   0xe   :  { %2258 = shalt.err (!%p2255_p7)
}
   0xf   :  { %s2262_s22 = smov 64   ;;  %s2263_s23 = smov 4  }
  0x10   :  { %22 = dma.hbm_to_vmem [thread:$0]  %s2688_s1, 1920, %s17_s13, [#allocation3], %s2262_s22, %s2262_s22, %s2263_s23  }
  0x11   :  { %2259 = dma.done.wait [#allocation3], 1920  }
  0x12   :  { %2260 = vsyncadd [#allocation3], 4294965376  ;;  %v2264_v0 = vmov 0.0   ;;  %vm2265_vm0 = vmmov 0   ;;  %v2142_v1 = vld [vmem:[#allocation2] sm:$0xff]   ;;  %v2305_v2 = vld [vmem:[#allocation2 + $0x8] sm:$0xff]  }
  0x13   :  { %1947 = vmatprep.subr.bf16.mxu1 %v2264_v0  ;;  %1951 = vmatprep.mubr.msk.bf16.mxu1 %vm2265_vm0, %v2264_v0  ;;  %v29_v3 = vld [vmem:[%s2687_s0] sm:$0xff]  ;;  %v1807_v4 = vld [vmem:[%s2687_s0 + $0x8] sm:$0xff]  ;;  %vm65_vm1 = vcmask 130048   ;;  %v1808_v5 = vld [vmem:[%s2687_s0 + $0x10] sm:$0xff]  ;;  %v2266_v10 = vmov 0   ;;  %s2267_s8 = smov 32  }
  0x14   :  { %1937 = vmatprep.subr.bf16.mxu0 %v2142_v1  ;;  %1948 = vmatpush3.bf16.msra.mxu1 %v2305_v2  ;;  %v51_v6 = vpack.c.bf16 %v1807_v4, %v29_v3  ;;  %v1809_v7 = vld [vmem:[%s2687_s0 + $0x18] sm:$0xff]  ;;  %v2321_v9 = vld [vmem:[#allocation2 + $0x10] sm:$0xff]   ;;  %v2342_v11 = vld [vmem:[%s2689_s2] ss:$0 sm:$0xff]  ;;  %vm155_vm2 = vcmask 261120  }
  0x15   :  { %1938 = vmatpush3.bf16.msra.mxu0 %v2142_v1  ;;  %1949 = vmatprep.subr.bf16.mxu1 %v2264_v0  ;;  %v52_v8 = vpack.c.bf16 %v1809_v7, %v1808_v5  ;;  %v1810_v49 = vld [vmem:[%s2687_s0 + $0x20] sm:$0xff]  ;;  %v1811_v50 = vld [vmem:[%s2687_s0 + $0x28] sm:$0xff]  ;;  %v1812_v51 = vld [vmem:[%s2687_s0 + $0x30] sm:$0xff] }
  0x16   :  { %1963 = vmatprep.subr.bf16.mxu0 %v2264_v0  ;;  %1939 = vmatprep.mubr.msk.bf16.mxu0 %vm65_vm1, %v51_v6  ;;  %v53_v52 = vpack.c.bf16 %v1811_v50, %v1810_v49  ;;  %v1813_v53 = vld [vmem:[%s2687_s0 + $0x38] sm:$0xff] }
  0x17   :  { %v54_v54 = vpack.c.bf16 %v1813_v53, %v1812_v51 }
  0x18   :  { %1940 = vmatmul.mubr.msk.bf16.vlgmr.msra.gmra.mrb[0].mxu0 %vm65_vm1, %v52_v8  ;;  %1950 = vmatpush3.bf16.msra.mxu1 %v2321_v9 }
  0x19   :  { %1964 = vmatpush3.bf16.msra.mxu0 %v2305_v2  ;;  %1955 = vmatprep.subr.bf16.mxu1 %v2264_v0 }
  0x1a   :  { %1965 = vmatprep.subr.bf16.mxu0 %v2264_v0  ;;  %1943 = vmatprep.mubr.msk.bf16.mxu0 %vm65_vm1, %v53_v52 }
  0x1b   :  { %1952 = vmatmul.mubr.bf16.vlgmr.msra.gmra.mrb[0].mxu1 %v2266_v10 }
  0x1c   :  { %1956 = vmatpush3.bf16.msra.mxu1 %v2305_v2  ;;  %1959 = vmatprep.mubr.msk.bf16.mxu1 %vm2265_vm0, %v2264_v0 }
  0x1d   :  { %1957 = vmatprep.subr.bf16.mxu1 %v2264_v0  ;;  %1966 = vmatpush3.bf16.msra.mxu0 %v2321_v9 }
  0x1e   :  { %1979 = vmatprep.subr.bf16.mxu0 %v2264_v0 }
  0x20   :  { %1958 = vmatpush3.bf16.msra.mxu1 %v2321_v9  ;;  %1944 = vmatmul.mubr.msk.bf16.gmra.mrb[4].mxu0 %vm65_vm1, %v54_v54 }
  0x21   :  { %1971 = vmatprep.subr.bf16.mxu1 %v2264_v0  ;;  %1967 = vmatprep.mubr.msk.bf16.mxu0 %vm2265_vm0, %v2264_v0 }
  0xeb   :  { %v2344_v12 = vpop.f32.mrb[0].mxu0 }
  0xec   :  { %v112_v13 = vpop.f32.mrb[1].mxu0  ;;  %v121_v1 = vadd.f32 %v2344_v12, %v2342_v11 }
  0xed   :  { %v113_v14 = vadd.f32 %v2342_v11, %v112_v13  ;;  %v2347_v15 = vpop.f32.mrb[2].mxu0 }
  0xee   :  { %v115_v16 = vpop.f32.mrb[3].mxu0  ;;  %v193_v17 = vpop.f32.mrb[0].mxu1 }
  0xef   :  { %v199_v18 = vadd.f32 %v193_v17, %v113_v14  ;;  %v1953_v19 = vpop.f32.mrb[1].mxu1  ;;  %v116_v35 = vadd.f32 %v2342_v11, %v115_v16 }
  0xf0   :  { %v196_v20 = vpop.f32.mrb[2].mxu1 }
  0xf1   :  { %2157 = vtanh.f32 %v199_v18  ;;  %v1954_v21 = vpop.f32.mrb[3].mxu1 }
  0xf3   :  { %v2389_v59 = vpop.f32.mrb[4].mxu0 }
  0xf4   :  { %v2391_v60 = vpop.f32.mrb[5].mxu0 }
  0xf5   :  { %v2393_v61 = vpop.f32.mrb[6].mxu0 }
  0xf6   :  { %v2395_v62 = vpop.f32.mrb[7].mxu0 }
  0xfb   :  { %v2158_v22 = vpop.eup %2157 }
  0xfc   :  { %205 = vrot.lane.b32.xlu0 %v2158_v22, %s2262_s22  ;;  %v201_v23 = vmul.f32 0.5, %v2158_v22 }
  0xfe   :  { %v202_v24 = vadd.f32 0.5, %v201_v23 }
 0x100   :  { %v203_v27 = vmul.f32 0.0, %v202_v24 }
 0x16e   :  { %v206_v25 = vpop.permute.xlu0 %205 }
 0x16f   :  { %v208_v26 = vmul.f32 %v206_v25, %v202_v24  ;;  %v124_v25 = vadd.f32 %v2347_v15, %v2342_v11 }
 0x171   :  { %210 = vrot.lane.b32.xlu0 %v208_v26, %s2267_s8 }
 0x1e3   :  { %v211_v28 = vpop.permute.xlu0 %210 }
 0x1e4   :  { %v213_v29 = vadd.f32 %v211_v28, %v203_v27 }
 0x1e6   :  { %2159 = vtanh.f32 %v213_v29 }
 0x1f0   :  { %v2160_v30 = vpop.eup %2159 }
 0x1f1   :  { %216 = vrot.lane.b32.xlu1 %v2160_v30, %s2262_s22 }
 0x263   :  { %v217_v31 = vpop.permute.xlu1 %216 }
 0x264   :  { %v2352_v32 = vmul.f32 %v217_v31, %v202_v24 }
 0x266   :  { %v220_v33 = vpack.c.bf16 %v2352_v32, %v2352_v32 }
 0x268   :  { %222 = vrot.lane.b32.xlu1 %v220_v33, %s2267_s8 }
 0x2da   :  { %v223_v34 = vpop.permute.xlu1 %222 }
 0x2db   :  { %1960 = vmatmul.mubr.msk.bf16.vlgmr.msra.gmra.mrb[4].mxu1 %vm155_vm2, %v223_v34 }
 0x2dc   :  { %1972 = vmatpush3.bf16.msra.mxu1 %v2305_v2  ;;  %1975 = vmatprep.mubr.msk.bf16.mxu1 %vm2265_vm0, %v2264_v0 }
 0x2dd   :  { %1973 = vmatprep.subr.bf16.mxu1 %v2264_v0 }
 0x2e0   :  { %1974 = vmatpush3.bf16.msra.mxu1 %v2321_v9 }
 0x2e1   :  { %1987 = vmatprep.subr.bf16.mxu1 %v2264_v0 }
 0x3ae   :  { %v261_v36 = vpop.f32.mrb[4].mxu1 }
 0x3af   :  { %v267_v37 = vadd.f32 %v261_v36, %v116_v35  ;;  %v1961_v38 = vpop.f32.mrb[5].mxu1 }
 0x3b0   :  { %v264_v39 = vpop.f32.mrb[6].mxu1 }
 0x3b1   :  { %2161 = vtanh.f32 %v267_v37  ;;  %v1962_v40 = vpop.f32.mrb[7].mxu1 }
 0x3bb   :  { %v2162_v41 = vpop.eup %2161 }
 0x3bc   :  { %273 = vrot.lane.b32.xlu0 %v2162_v41, %s2262_s22  ;;  %v269_v42 = vmul.f32 0.5, %v2162_v41 }
 0x3be   :  { %v270_v43 = vadd.f32 0.5, %v269_v42 }
 0x3c0   :  { %v271_v46 = vmul.f32 %v270_v43, %v213_v29 }
 0x42e   :  { %v274_v44 = vpop.permute.xlu0 %273 }
 0x42f   :  { %v276_v45 = vmul.f32 %v274_v44, %v270_v43  ;;  %v129_v44 = vadd.f32 %v2342_v11, %v2391_v60 }
 0x431   :  { %278 = vrot.lane.b32.xlu1 %v276_v45, %s2267_s8 }
 0x4a3   :  { %v279_v47 = vpop.permute.xlu1 %278 }
 0x4a4   :  { %v281_v48 = vadd.f32 %v279_v47, %v271_v46 }
 0x4a6   :  { %2163 = vtanh.f32 %v281_v48 }
 0x4b0   :  { %v2164_v55 = vpop.eup %2163 }
 0x4b1   :  { %284 = vrot.lane.b32.xlu0 %v2164_v55, %s2262_s22 }
 0x523   :  { %v285_v56 = vpop.permute.xlu0 %284 }
 0x524   :  { %v2384_v57 = vmul.f32 %v285_v56, %v270_v43 }
 0x526   :  { %v288_v58 = vpack.c.bf16 %v2384_v57, %v2384_v57 }
 0x528   :  { %290 = vrot.lane.b32.xlu1 %v288_v58, %s2267_s8 }
 0x59a   :  { %v291_v63 = vpop.permute.xlu1 %290 }
 0x59b   :  { %1968 = vmatmul.mubr.msk.bf16.vlgmr.msra.gmra.mrb[8].mxu0 %vm155_vm2, %v291_v63 }
 0x59c   :  { %1980 = vmatpush3.bf16.msra.mxu0 %v2305_v2  ;;  %1983 = vmatprep.mubr.msk.bf16.mxu0 %vm2265_vm0, %v2264_v0 }
 0x59d   :  { %1981 = vmatprep.subr.bf16.mxu0 %v2264_v0 }
 0x5a0   :  { %1982 = vmatpush3.bf16.msra.mxu0 %v2321_v9 }
 0x5a1   :  { %1995 = vmatprep.subr.bf16.mxu0 %v2264_v0 }
 0x66e   :  { %v329_v3 = vpop.f32.mrb[8].mxu0 }
 0x66f   :  { %v335_v4 = vadd.f32 %v329_v3, %v121_v1  ;;  %v1969_v5 = vpop.f32.mrb[9].mxu0 }
 0x670   :  { %v332_v6 = vpop.f32.mrb[10].mxu0  ;;  %v132_v5 = vadd.f32 %v2342_v11, %v2395_v62 }
 0x671   :  { %2165 = vtanh.f32 %v335_v4  ;;  %v1970_v7 = vpop.f32.mrb[11].mxu0 }
 0x67b   :  { %v2166_v8 = vpop.eup %2165 }
 0x67c   :  { %341 = vrot.lane.b32.xlu0 %v2166_v8, %s2262_s22  ;;  %v337_v13 = vmul.f32 0.5, %v2166_v8 }
 0x67e   :  { %v338_v14 = vadd.f32 0.5, %v337_v13 }
 0x680   :  { %v339_v18 = vmul.f32 %v338_v14, %v281_v48 }
 0x6ee   :  { %v342_v16 = vpop.permute.xlu0 %341 }
 0x6ef   :  { %v344_v17 = vmul.f32 %v342_v16, %v338_v14 }
 0x6f1   :  { %346 = vrot.lane.b32.xlu1 %v344_v17, %s2267_s8 }
 0x763   :  { %v347_v19 = vpop.permute.xlu1 %346 }
 0x764   :  { %v349_v20 = vadd.f32 %v347_v19, %v339_v18 }
 0x766   :  { %2167 = vtanh.f32 %v349_v20 }
 0x770   :  { %v2168_v12 = vpop.eup %2167 }
 0x771   :  { %352 = vrot.lane.b32.xlu0 %v2168_v12, %s2262_s22 }
 0x7e3   :  { %v353_v21 = vpop.permute.xlu0 %352 }
 0x7e4   :  { %v2409_v22 = vmul.f32 %v353_v21, %v338_v14 }
 0x7e6   :  { %v356_v23 = vpack.c.bf16 %v2409_v22, %v2409_v22 }
 0x7e8   :  { %358 = vrot.lane.b32.xlu1 %v356_v23, %s2267_s8 }
 0x85a   :  { %v359_v24 = vpop.permute.xlu1 %358 }
 0x85b   :  { %1976 = vmatmul.mubr.msk.bf16.vlgmr.msra.gmra.mrb[8].mxu1 %vm155_vm2, %v359_v24 }
 0x85c   :  { %1988 = vmatpush3.bf16.msra.mxu1 %v2305_v2  ;;  %1991 = vmatprep.mubr.msk.bf16.mxu1 %vm2265_vm0, %v2264_v0 }
 0x85d   :  { %1989 = vmatprep.subr.bf16.mxu1 %v2264_v0 }
 0x860   :  { %1990 = vmatpush3.bf16.msra.mxu1 %v2321_v9 }
 0x861   :  { %2003 = vmatprep.subr.bf16.mxu1 %v2264_v0 }
 0x92e   :  { %v397_v26 = vpop.f32.mrb[8].mxu1 }
 0x92f   :  { %v403_v27 = vadd.f32 %v397_v26, %v124_v25  ;;  %v1977_v28 = vpop.f32.mrb[9].mxu1  ;;  %v137_v26 = vadd.f32 %v2389_v59, %v2342_v11  ;;  %v2145_v59 = vld [vmem:[#allocation2 + $0x18] sm:$0xff]  }
 0x930   :  { %v400_v29 = vpop.f32.mrb[10].mxu1 }
 0x931   :  { %2169 = vtanh.f32 %v403_v27  ;;  %v1978_v30 = vpop.f32.mrb[11].mxu1 }
 0x93b   :  { %v2170_v31 = vpop.eup %2169 }
 0x93c   :  { %409 = vrot.lane.b32.xlu0 %v2170_v31, %s2262_s22  ;;  %v405_v33 = vmul.f32 0.5, %v2170_v31 }
 0x93e   :  { %v406_v34 = vadd.f32 0.5, %v405_v33 }
 0x940   :  { %v407_v37 = vmul.f32 %v406_v34, %v349_v20 }
 0x9ae   :  { %v410_v35 = vpop.permute.xlu0 %409 }
 0x9af   :  { %v412_v36 = vmul.f32 %v410_v35, %v406_v34 }
 0x9b1   :  { %414 = vrot.lane.b32.xlu1 %v412_v36, %s2267_s8 }
 0xa23   :  { %v415_v38 = vpop.permute.xlu1 %414 }
 0xa24   :  { %v417_v39 = vadd.f32 %v415_v38, %v407_v37 }
 0xa26   :  { %2171 = vtanh.f32 %v417_v39 }
 0xa30   :  { %v2172_v15 = vpop.eup %2171 }
 0xa31   :  { %420 = vrot.lane.b32.xlu0 %v2172_v15, %s2262_s22 }
 0xaa3   :  { %v421_v40 = vpop.permute.xlu0 %420 }
 0xaa4   :  { %v2426_v41 = vmul.f32 %v421_v40, %v406_v34 }
 0xaa6   :  { %v424_v42 = vpack.c.bf16 %v2426_v41, %v2426_v41 }
 0xaa8   :  { %426 = vrot.lane.b32.xlu1 %v424_v42, %s2267_s8  ;;  %v705_v42 = vpack.c.bf16 %v2384_v57, %v2352_v32  ;;  %v706_v32 = vpack.c.bf16 %v2426_v41, %v2409_v22  ;;  %v2486_v57 = vld [vmem:[#allocation2 + $0x28] sm:$0xff]   ;;  %v140_v22 = vadd.f32 %v2393_v61, %v2342_v11 }
 0xb1a   :  { %v427_v43 = vpop.permute.xlu1 %426 }
 0xb1b   :  { %1984 = vmatmul.mubr.msk.bf16.vlgmr.msra.gmra.mrb[12].mxu0 %vm155_vm2, %v427_v43  ;;  %v2146_v43 = vld [vmem:[#allocation2 + $0x20] sm:$0xff]  }
 0xb1c   :  { %1996 = vmatpush3.bf16.msra.mxu0 %v2305_v2  ;;  %1999 = vmatprep.mubr.msk.bf16.mxu0 %vm2265_vm0, %v2264_v0 }
 0xb1d   :  { %1997 = vmatprep.subr.bf16.mxu0 %v2264_v0 }
 0xb20   :  { %1998 = vmatpush3.bf16.msra.mxu0 %v2321_v9 }
 0xb21   :  { %2011 = vmatprep.subr.bf16.mxu0 %v2145_v59 }
 0xbee   :  { %v465_v45 = vpop.f32.mrb[12].mxu0 }
 0xbef   :  { %v471_v46 = vadd.f32 %v465_v45, %v129_v44  ;;  %v1985_v47 = vpop.f32.mrb[13].mxu0 }
 0xbf0   :  { %v468_v48 = vpop.f32.mrb[14].mxu0 }
 0xbf1   :  { %2173 = vtanh.f32 %v471_v46  ;;  %v1986_v49 = vpop.f32.mrb[15].mxu0 }
 0xbf2   :  { %v2490_v49 = vld [vmem:[#allocation2 + $0x30] sm:$0xff]  }
 0xbfb   :  { %v2174_v50 = vpop.eup %2173 }
 0xbfc   :  { %477 = vrot.lane.b32.xlu0 %v2174_v50, %s2262_s22  ;;  %v473_v51 = vmul.f32 0.5, %v2174_v50 }
 0xbfe   :  { %v474_v52 = vadd.f32 0.5, %v473_v51 }
 0xc00   :  { %v475_v55 = vmul.f32 %v474_v52, %v417_v39 }
 0xc6e   :  { %v478_v53 = vpop.permute.xlu0 %477 }
 0xc6f   :  { %v480_v54 = vmul.f32 %v478_v53, %v474_v52 }
 0xc71   :  { %482 = vrot.lane.b32.xlu1 %v480_v54, %s2267_s8 }
 0xce3   :  { %v483_v56 = vpop.permute.xlu1 %482 }
 0xce4   :  { %v485_v58 = vadd.f32 %v483_v56, %v475_v55  ;;  %v2514_v55 = vld [vmem:[%s2689_s2 + $0x1] ss:$0 sm:$0xff] }
 0xce6   :  { %2175 = vtanh.f32 %v485_v58 }
 0xcf0   :  { %v2176_v60 = vpop.eup %2175 }
 0xcf1   :  { %488 = vrot.lane.b32.xlu0 %v2176_v60, %s2262_s22 }
 0xd63   :  { %v489_v63 = vpop.permute.xlu0 %488 }
 0xd64   :  { %v2442_v1 = vmul.f32 %v489_v63, %v474_v52 }
 0xd66   :  { %v492_v3 = vpack.c.bf16 %v2442_v1, %v2442_v1 }
 0xd68   :  { %494 = vrot.lane.b32.xlu1 %v492_v3, %s2267_s8 }
 0xdda   :  { %v495_v4 = vpop.permute.xlu1 %494 }
 0xddb   :  { %1992 = vmatmul.mubr.msk.bf16.vlgmr.msra.gmra.mrb[12].mxu1 %vm155_vm2, %v495_v4 }
 0xddc   :  { %2004 = vmatpush3.bf16.msra.mxu1 %v2305_v2  ;;  %2007 = vmatprep.mubr.msk.bf16.mxu1 %vm2265_vm0, %v2264_v0 }
 0xddd   :  { %2005 = vmatprep.subr.bf16.mxu1 %v2264_v0 }
 0xde0   :  { %2006 = vmatpush3.bf16.msra.mxu1 %v2321_v9 }
 0xde1   :  { %2023 = vmatprep.subr.bf16.mxu1 %v2264_v0 }
 0xeae   :  { %v533_v6 = vpop.f32.mrb[12].mxu1 }
 0xeaf   :  { %v539_v7 = vadd.f32 %v533_v6, %v132_v5  ;;  %v1993_v8 = vpop.f32.mrb[13].mxu1 }
 0xeb0   :  { %v536_v13 = vpop.f32.mrb[14].mxu1 }
 0xeb1   :  { %2177 = vtanh.f32 %v539_v7  ;;  %v1994_v14 = vpop.f32.mrb[15].mxu1 }
 0xebb   :  { %v2178_v16 = vpop.eup %2177 }
 0xebc   :  { %545 = vrot.lane.b32.xlu0 %v2178_v16, %s2262_s22  ;;  %v541_v2 = vmul.f32 0.5, %v2178_v16 }
 0xebe   :  { %v542_v17 = vadd.f32 0.5, %v541_v2 }
 0xec0   :  { %v543_v9 = vmul.f32 %v542_v17, %v485_v58 }
 0xf2e   :  { %v546_v18 = vpop.permute.xlu0 %545 }
 0xf2f   :  { %v548_v19 = vmul.f32 %v546_v18, %v542_v17 }
 0xf31   :  { %550 = vrot.lane.b32.xlu1 %v548_v19, %s2267_s8 }
 0xfa3   :  { %v551_v20 = vpop.permute.xlu1 %550 }
 0xfa4   :  { %v553_v12 = vadd.f32 %v551_v20, %v543_v9 }
 0xfa6   :  { %2179 = vtanh.f32 %v553_v12 }
 0xfb0   :  { %v2180_v62 = vpop.eup %2179 }
 0xfb1   :  { %556 = vrot.lane.b32.xlu0 %v2180_v62, %s2262_s22 }
0x1023   :  { %v557_v21 = vpop.permute.xlu0 %556 }
0x1024   :  { %v2459_v23 = vmul.f32 %v557_v21, %v542_v17 }
0x1026   :  { %v560_v24 = vpack.c.bf16 %v2459_v23, %v2459_v23 }
0x1028   :  { %562 = vrot.lane.b32.xlu1 %v560_v24, %s2267_s8 }
0x109a   :  { %v563_v25 = vpop.permute.xlu1 %562 }
0x109b   :  { %2000 = vmatmul.mubr.msk.bf16.vlgmr.msra.gmra.mrb[16].mxu0 %vm155_vm2, %v563_v25 }
0x109c   :  { %2012 = vmatpush3.bf16.msra.mxu0 %v2145_v59 }
0x109d   :  { %2013 = vmatprep.subr.bf16.mxu0 %v2146_v43 }
0x10a0   :  { %2014 = vmatpush3.bf16.msra.mxu0 %v2146_v43 }
0x10a1   :  { %2039 = vmatprep.subr.bf16.mxu0 %v2264_v0 }
0x116e   :  { %v601_v27 = vpop.f32.mrb[16].mxu0 }
0x116f   :  { %v607_v28 = vadd.f32 %v601_v27, %v137_v26  ;;  %v2001_v29 = vpop.f32.mrb[17].mxu0 }
0x1170   :  { %v604_v30 = vpop.f32.mrb[18].mxu0 }
0x1171   :  { %2181 = vtanh.f32 %v607_v28  ;;  %v2002_v31 = vpop.f32.mrb[19].mxu0 }
0x117b   :  { %v2182_v33 = vpop.eup %2181 }
0x117c   :  { %613 = vrot.lane.b32.xlu0 %v2182_v33, %s2262_s22  ;;  %v609_v34 = vmul.f32 0.5, %v2182_v33  ;;  %v707_v33 = vpack.c.bf16 %v2459_v23, %v2442_v1 }
0x117e   :  { %v610_v35 = vadd.f32 0.5, %v609_v34 }
0x1180   :  { %v611_v38 = vmul.f32 %v610_v35, %v553_v12 }
0x11ee   :  { %v614_v36 = vpop.permute.xlu0 %613 }
0x11ef   :  { %v616_v37 = vmul.f32 %v614_v36, %v610_v35 }
0x11f1   :  { %618 = vrot.lane.b32.xlu1 %v616_v37, %s2267_s8 }
0x1263   :  { %v619_v39 = vpop.permute.xlu1 %618 }
0x1264   :  { %v2469_v15 = vadd.f32 %v619_v39, %v611_v38 }
0x1266   :  { %2183 = vtanh.f32 %v2469_v15 }
0x1270   :  { %v2184_v40 = vpop.eup %2183 }
0x1271   :  { %624 = vrot.lane.b32.xlu0 %v2184_v40, %s2262_s22 }
0x1275   :  { %717 = vrot.lane.b32.xlu0 %v705_v42, %s2267_s8 }
0x12e3   :  { %v625_v44 = vpop.permute.xlu0 %624 }
0x12e4   :  { %v2477_v45 = vmul.f32 %v625_v44, %v610_v35 }
0x12e6   :  { %v628_v46 = vpack.c.bf16 %v2477_v45, %v2477_v45 }
0x12e7   :  { %v718_v47 = vpop.permute.xlu0 %717 }
0x12e8   :  { %630 = vrot.lane.b32.xlu1 %v628_v46, %s2267_s8  ;;  %2015 = vmatprep.mubr.msk.bf16.mxu0 %vm155_vm2, %v718_v47 }
0x12ec   :  { %719 = vrot.lane.b32.xlu1 %v706_v32, %s2267_s8 }
0x135a   :  { %v631_v48 = vpop.permute.xlu1 %630 }
0x135b   :  { %2008 = vmatmul.mubr.msk.bf16.vlgmr.msra.gmra.mrb[16].mxu1 %vm155_vm2, %v631_v48 }
0x135c   :  { %2024 = vmatpush3.bf16.msra.mxu1 %v2486_v57  ;;  %2027 = vmatprep.mubr.msk.bf16.mxu1 %vm2265_vm0, %v2264_v0 }
0x135d   :  { %2025 = vmatprep.subr.bf16.mxu1 %v2264_v0 }
0x135e   :  { %v720_v50 = vpop.permute.xlu1 %719 }
0x135f   :  { %2016 = vmatmul.mubr.msk.bf16.vlgmr.msra.gmra.mrb[20].mxu0 %vm155_vm2, %v720_v50 }
0x1360   :  { %2026 = vmatpush3.bf16.msra.mxu1 %v2490_v49  ;;  %2040 = vmatpush3.bf16.msra.mxu0 %v2486_v57 }
0x1361   :  { %2031 = vmatprep.subr.bf16.mxu1 %v2264_v0  ;;  %2041 = vmatprep.subr.bf16.mxu0 %v2264_v0 }
0x1363   :  { %2028 = vmatmul.mubr.bf16.vlgmr.msra.gmra.mrb[20].mxu1 %v2266_v10 }
0x1364   :  { %2032 = vmatpush3.bf16.msra.mxu1 %v2486_v57  ;;  %2035 = vmatprep.mubr.msk.bf16.mxu1 %vm2265_vm0, %v2264_v0 }
0x1365   :  { %2033 = vmatprep.subr.bf16.mxu1 %v2264_v0  ;;  %2042 = vmatpush3.bf16.msra.mxu0 %v2490_v49 }
0x1366   :  { %2055 = vmatprep.subr.bf16.mxu0 %v2264_v0 }
0x1368   :  { %2034 = vmatpush3.bf16.msra.mxu1 %v2490_v49 }
0x1369   :  { %2047 = vmatprep.subr.bf16.mxu1 %v2264_v0 }
0x142e   :  { %v669_v41 = vpop.f32.mrb[16].mxu1 }
0x142f   :  { %v675_v51 = vadd.f32 %v669_v41, %v140_v22  ;;  %v2009_v52 = vpop.f32.mrb[17].mxu1 }
0x1430   :  { %v672_v53 = vpop.f32.mrb[18].mxu1 }
0x1431   :  { %v2010_v54 = vpop.f32.mrb[19].mxu1 }
0x1432   :  { %v2516_v56 = vpop.f32.mrb[20].mxu0 }
0x1433   :  { %v783_v58 = vpop.f32.mrb[21].mxu0 }
0x1434   :  { %v784_v60 = vadd.f32 %v2514_v55, %v783_v58  ;;  %v2519_v63 = vpop.f32.mrb[22].mxu0 }
0x1435   :  { %v786_v3 = vpop.f32.mrb[23].mxu0 }
0x1436   :  { %v860_v4 = vpop.f32.mrb[20].mxu1  ;;  %v787_v36 = vadd.f32 %v2514_v55, %v786_v3  ;;  %v792_v3 = vadd.f32 %v2516_v56, %v2514_v55 }
0x1437   :  { %v866_v11 = vadd.f32 %v860_v4, %v784_v60  ;;  %v2029_v61 = vpop.f32.mrb[21].mxu1 }
0x1438   :  { %v863_v5 = vpop.f32.mrb[22].mxu1 }
0x1439   :  { %2185 = vtanh.f32 %v866_v11  ;;  %v2030_v6 = vpop.f32.mrb[23].mxu1 }
0x1443   :  { %v2186_v7 = vpop.eup %2185 }
0x1444   :  { %872 = vrot.lane.b32.xlu0 %v2186_v7, %s2262_s22  ;;  %v868_v8 = vmul.f32 0.5, %v2186_v7 }
0x1446   :  { %v869_v13 = vadd.f32 0.5, %v868_v8 }
0x1448   :  { %v870_v2 = vmul.f32 0.0, %v869_v13 }
0x14b6   :  { %v873_v14 = vpop.permute.xlu0 %872 }
0x14b7   :  { %v875_v16 = vmul.f32 %v873_v14, %v869_v13 }
0x14b9   :  { %877 = vrot.lane.b32.xlu1 %v875_v16, %s2267_s8 }
0x152b   :  { %v878_v17 = vpop.permute.xlu1 %877 }
0x152c   :  { %v880_v18 = vadd.f32 %v878_v17, %v870_v2 }
0x152e   :  { %2187 = vtanh.f32 %v880_v18 }
0x152f   :  { %2189 = vtanh.f32 %v675_v51 }
0x1538   :  { %v2188_v19 = vpop.eup %2187 }
0x1539   :  { %883 = vrot.lane.b32.xlu0 %v2188_v19, %s2262_s22  ;;  %v2190_v9 = vpop.eup %2189 }
0x153a   :  { %v677_v20 = vmul.f32 0.5, %v2190_v9 }
0x153c   :  { %v678_v24 = vadd.f32 0.5, %v677_v20 }
0x153d   :  { %681 = vrot.lane.b32.xlu0 %v2190_v9, %s2262_s22 }
0x153e   :  { %v679_v28 = vmul.f32 %v678_v24, %v2469_v15 }
0x15ab   :  { %v884_v12 = vpop.permute.xlu0 %883 }
0x15ac   :  { %v886_v62 = vmul.f32 %v884_v12, %v869_v13 }
0x15ae   :  { %v887_v21 = vpack.c.bf16 %v886_v62, %v886_v62  ;;  %v795_v62 = vadd.f32 %v2519_v63, %v2514_v55 }
0x15af   :  { %v682_v25 = vpop.permute.xlu0 %681 }
0x15b0   :  { %v684_v26 = vmul.f32 %v682_v25, %v678_v24  ;;  %889 = vrot.lane.b32.xlu1 %v887_v21, %s2267_s8 }
0x15b2   :  { %686 = vrot.lane.b32.xlu0 %v684_v26, %s2267_s8 }
0x1622   :  { %v890_v27 = vpop.permute.xlu1 %889 }
0x1623   :  { %2036 = vmatmul.mubr.msk.bf16.vlgmr.msra.gmra.mrb[24].mxu1 %vm155_vm2, %v890_v27 }
0x1624   :  { %v687_v29 = vpop.permute.xlu0 %686  ;;  %2048 = vmatpush3.bf16.msra.mxu1 %v2486_v57  ;;  %2051 = vmatprep.mubr.msk.bf16.mxu1 %vm2265_vm0, %v2264_v0 }
0x1625   :  { %v689_v30 = vadd.f32 %v687_v29, %v679_v28  ;;  %2049 = vmatprep.subr.bf16.mxu1 %v2264_v0 }
0x1627   :  { %2191 = vtanh.f32 %v689_v30 }
0x1628   :  { %2050 = vmatpush3.bf16.msra.mxu1 %v2490_v49 }
0x1629   :  { %2063 = vmatprep.subr.bf16.mxu1 %v2264_v0 }
0x1631   :  { %v2192_v31 = vpop.eup %2191 }
0x1632   :  { %692 = vrot.lane.b32.xlu0 %v2192_v31, %s2262_s22 }
0x1636   :  { %721 = vrot.lane.b32.xlu0 %v707_v33, %s2267_s8 }
0x16a4   :  { %v693_v34 = vpop.permute.xlu0 %692 }
0x16a5   :  { %v2543_v32 = vmul.f32 %v693_v34, %v678_v24 }
0x16a7   :  { %v708_v50 = vpack.c.bf16 %v2543_v32, %v2477_v45 }
0x16a8   :  { %v722_v35 = vpop.permute.xlu0 %721 }
0x16a9   :  { %2019 = vmatprep.mubr.msk.bf16.mxu0 %vm155_vm2, %v722_v35 }
0x16f6   :  { %v928_v37 = vpop.f32.mrb[24].mxu1 }
0x16f7   :  { %v934_v38 = vadd.f32 %v928_v37, %v787_v36  ;;  %v2037_v39 = vpop.f32.mrb[25].mxu1 }
0x16f8   :  { %v931_v15 = vpop.f32.mrb[26].mxu1 }
0x16f9   :  { %2193 = vtanh.f32 %v934_v38  ;;  %v2038_v59 = vpop.f32.mrb[27].mxu1 }
0x1703   :  { %v2194_v40 = vpop.eup %2193 }
0x1704   :  { %940 = vrot.lane.b32.xlu1 %v2194_v40, %s2262_s22  ;;  %v936_v42 = vmul.f32 0.5, %v2194_v40 }
0x1706   :  { %v937_v43 = vadd.f32 0.5, %v936_v42 }
0x1708   :  { %v938_v44 = vmul.f32 %v937_v43, %v880_v18 }
0x1776   :  { %v941_v1 = vpop.permute.xlu1 %940 }
0x1777   :  { %v943_v23 = vmul.f32 %v941_v1, %v937_v43 }
0x1779   :  { %945 = vrot.lane.b32.xlu1 %v943_v23, %s2267_s8 }
0x17eb   :  { %v946_v46 = vpop.permute.xlu1 %945 }
0x17ec   :  { %v948_v47 = vadd.f32 %v946_v46, %v938_v44 }
0x17ee   :  { %2195 = vtanh.f32 %v948_v47 }
0x17f8   :  { %v2196_v48 = vpop.eup %2195 }
0x17f9   :  { %951 = vrot.lane.b32.xlu1 %v2196_v48, %s2262_s22 }
0x17fd   :  { %723 = vrot.lane.b32.xlu1 %v708_v50, %s2267_s8 }
0x186b   :  { %v952_v22 = vpop.permute.xlu1 %951 }
0x186c   :  { %v954_v41 = vmul.f32 %v952_v22, %v937_v43 }
0x186e   :  { %v955_v51 = vpack.c.bf16 %v954_v41, %v954_v41 }
0x186f   :  { %v724_v52 = vpop.permute.xlu1 %723 }
0x1870   :  { %957 = vrot.lane.b32.xlu0 %v955_v51, %s2267_s8  ;;  %2020 = vmatmul.mubr.msk.bf16.gmra.mrb[24].mxu0 %vm155_vm2, %v724_v52 }
0x1871   :  { %2043 = vmatprep.mubr.msk.bf16.mxu0 %vm2265_vm0, %v2264_v0 }
0x18e2   :  { %v958_v53 = vpop.permute.xlu0 %957 }
0x18e3   :  { %2044 = vmatmul.mubr.msk.bf16.vlgmr.msra.gmra.mrb[28].mxu0 %vm155_vm2, %v958_v53 }
0x18e4   :  { %2056 = vmatpush3.bf16.msra.mxu0 %v2486_v57  ;;  %2059 = vmatprep.mubr.msk.bf16.mxu0 %vm2265_vm0, %v2264_v0 }
0x18e5   :  { %2057 = vmatprep.subr.bf16.mxu0 %v2264_v0 }
0x18e8   :  { %2058 = vmatpush3.bf16.msra.mxu0 %v2490_v49 }
0x18e9   :  { %2071 = vmatprep.subr.bf16.mxu0 %v2264_v0 }
0x1943   :  { %v2560_v45 = vpop.f32.mrb[24].mxu0 }
0x1944   :  { %v2562_v54 = vpop.f32.mrb[25].mxu0 }
0x1945   :  { %v2564_v58 = vpop.f32.mrb[26].mxu0  ;;  %v800_v59 = vadd.f32 %v2514_v55, %v2562_v54 }
0x1946   :  { %v2566_v60 = vpop.f32.mrb[27].mxu0 }
0x19b6   :  { %v996_v4 = vpop.f32.mrb[28].mxu0 }
0x19b7   :  { %v1002_v11 = vadd.f32 %v996_v4, %v792_v3  ;;  %v2045_v61 = vpop.f32.mrb[29].mxu0 }
0x19b8   :  { %v999_v5 = vpop.f32.mrb[30].mxu0 }
0x19b9   :  { %2197 = vtanh.f32 %v1002_v11  ;;  %v2046_v6 = vpop.f32.mrb[31].mxu0  ;;  %v803_v11 = vadd.f32 %v2514_v55, %v2566_v60 }
0x19c3   :  { %v2198_v7 = vpop.eup %2197 }
0x19c4   :  { %1008 = vrot.lane.b32.xlu1 %v2198_v7, %s2262_s22  ;;  %v1004_v8 = vmul.f32 0.5, %v2198_v7 }
0x19c6   :  { %v1005_v13 = vadd.f32 0.5, %v1004_v8 }
0x19c8   :  { %v1006_v2 = vmul.f32 %v1005_v13, %v948_v47 }
0x1a36   :  { %v1009_v14 = vpop.permute.xlu1 %1008 }
0x1a37   :  { %v1011_v16 = vmul.f32 %v1009_v14, %v1005_v13 }
0x1a39   :  { %1013 = vrot.lane.b32.xlu0 %v1011_v16, %s2267_s8 }
0x1aab   :  { %v1014_v17 = vpop.permute.xlu0 %1013 }
0x1aac   :  { %v1016_v18 = vadd.f32 %v1014_v17, %v1006_v2 }
0x1aae   :  { %2199 = vtanh.f32 %v1016_v18 }
0x1ab8   :  { %v2200_v56 = vpop.eup %2199 }
0x1ab9   :  { %1019 = vrot.lane.b32.xlu1 %v2200_v56, %s2262_s22 }
0x1b2b   :  { %v1020_v19 = vpop.permute.xlu1 %1019 }
0x1b2c   :  { %v1022_v9 = vmul.f32 %v1020_v19, %v1005_v13 }
0x1b2e   :  { %v1023_v20 = vpack.c.bf16 %v1022_v9, %v1022_v9 }
0x1b30   :  { %1025 = vrot.lane.b32.xlu0 %v1023_v20, %s2267_s8 }
0x1ba2   :  { %v1026_v12 = vpop.permute.xlu0 %1025 }
0x1ba3   :  { %2052 = vmatmul.mubr.msk.bf16.vlgmr.msra.gmra.mrb[28].mxu1 %vm155_vm2, %v1026_v12  ;;  %v808_v12 = vadd.f32 %v2560_v45, %v2514_v55 }
0x1ba4   :  { %2064 = vmatpush3.bf16.msra.mxu1 %v2486_v57  ;;  %2067 = vmatprep.mubr.msk.bf16.mxu1 %vm2265_vm0, %v2264_v0 }
0x1ba5   :  { %2065 = vmatprep.subr.bf16.mxu1 %v2264_v0 }
0x1ba8   :  { %2066 = vmatpush3.bf16.msra.mxu1 %v2490_v49 }
0x1ba9   :  { %2079 = vmatprep.subr.bf16.mxu1 %v2264_v0 }
0x1c76   :  { %v1064_v21 = vpop.f32.mrb[28].mxu1 }
0x1c77   :  { %v1070_v24 = vadd.f32 %v1064_v21, %v795_v62  ;;  %v2053_v25 = vpop.f32.mrb[29].mxu1 }
0x1c78   :  { %v1067_v26 = vpop.f32.mrb[30].mxu1 }
0x1c79   :  { %2201 = vtanh.f32 %v1070_v24  ;;  %v2054_v27 = vpop.f32.mrb[31].mxu1 }
0x1c83   :  { %v2202_v28 = vpop.eup %2201 }
0x1c84   :  { %1076 = vrot.lane.b32.xlu1 %v2202_v28, %s2262_s22  ;;  %v1072_v29 = vmul.f32 0.5, %v2202_v28 }
0x1c86   :  { %v1073_v30 = vadd.f32 0.5, %v1072_v29 }
0x1c88   :  { %v1074_v34 = vmul.f32 %v1073_v30, %v1016_v18 }
0x1cf6   :  { %v1077_v31 = vpop.permute.xlu1 %1076 }
0x1cf7   :  { %v1079_v33 = vmul.f32 %v1077_v31, %v1073_v30 }
0x1cf9   :  { %1081 = vrot.lane.b32.xlu0 %v1079_v33, %s2267_s8 }
0x1d6b   :  { %v1082_v35 = vpop.permute.xlu0 %1081 }
0x1d6c   :  { %v1084_v36 = vadd.f32 %v1082_v35, %v1074_v34 }
0x1d6e   :  { %2203 = vtanh.f32 %v1084_v36 }
0x1d78   :  { %v2204_v63 = vpop.eup %2203 }
0x1d79   :  { %1087 = vrot.lane.b32.xlu1 %v2204_v63, %s2262_s22 }
0x1deb   :  { %v1088_v37 = vpop.permute.xlu1 %1087 }
0x1dec   :  { %v1090_v38 = vmul.f32 %v1088_v37, %v1073_v30 }
0x1dee   :  { %v1091_v39 = vpack.c.bf16 %v1090_v38, %v1090_v38 }
0x1df0   :  { %1093 = vrot.lane.b32.xlu0 %v1091_v39, %s2267_s8  ;;  %v811_v39 = vadd.f32 %v2564_v58, %v2514_v55  ;;  %v2149_v55 = vld [vmem:[#allocation2 + $0x38] sm:$0xff]   ;;  %v2150_v58 = vld [vmem:[#allocation2 + $0x48] sm:$0xff]  }
0x1e62   :  { %v1094_v15 = vpop.permute.xlu0 %1093 }
0x1e63   :  { %2060 = vmatmul.mubr.msk.bf16.vlgmr.msra.gmra.mrb[32].mxu0 %vm155_vm2, %v1094_v15 }
0x1e64   :  { %2072 = vmatpush3.bf16.msra.mxu0 %v2486_v57  ;;  %2075 = vmatprep.mubr.msk.bf16.mxu0 %vm2265_vm0, %v2264_v0 }
0x1e65   :  { %2073 = vmatprep.subr.bf16.mxu0 %v2264_v0 }
0x1e68   :  { %2074 = vmatpush3.bf16.msra.mxu0 %v2490_v49 }
0x1e69   :  { %2087 = vmatprep.subr.bf16.mxu0 %v2264_v0 }
0x1f36   :  { %v1132_v40 = vpop.f32.mrb[32].mxu0 }
0x1f37   :  { %v1138_v42 = vadd.f32 %v1132_v40, %v800_v59  ;;  %v2061_v43 = vpop.f32.mrb[33].mxu0 }
0x1f38   :  { %v1135_v1 = vpop.f32.mrb[34].mxu0 }
0x1f39   :  { %2205 = vtanh.f32 %v1138_v42  ;;  %v2062_v23 = vpop.f32.mrb[35].mxu0 }
0x1f43   :  { %v2206_v44 = vpop.eup %2205 }
0x1f44   :  { %1144 = vrot.lane.b32.xlu1 %v2206_v44, %s2262_s22  ;;  %v1140_v46 = vmul.f32 0.5, %v2206_v44 }
0x1f46   :  { %v1141_v47 = vadd.f32 0.5, %v1140_v46 }
0x1f48   :  { %v1142_v22 = vmul.f32 %v1141_v47, %v1084_v36 }
0x1fb6   :  { %v1145_v48 = vpop.permute.xlu1 %1144 }
0x1fb7   :  { %v1147_v50 = vmul.f32 %v1145_v48, %v1141_v47 }
0x1fb9   :  { %1149 = vrot.lane.b32.xlu0 %v1147_v50, %s2267_s8 }
0x202b   :  { %v1150_v41 = vpop.permute.xlu0 %1149 }
0x202c   :  { %v1152_v51 = vadd.f32 %v1150_v41, %v1142_v22  ;;  %v2151_v41 = vld [vmem:[#allocation2 + $0x40] sm:$0xff]  }
0x202e   :  { %2207 = vtanh.f32 %v1152_v51 }
0x2038   :  { %v2208_v52 = vpop.eup %2207 }
0x2039   :  { %1155 = vrot.lane.b32.xlu1 %v2208_v52, %s2262_s22 }
0x20ab   :  { %v1156_v53 = vpop.permute.xlu1 %1155 }
0x20ac   :  { %v1158_v54 = vmul.f32 %v1156_v53, %v1141_v47 }
0x20ae   :  { %v1159_v3 = vpack.c.bf16 %v1158_v54, %v1158_v54 }
0x20b0   :  { %1161 = vrot.lane.b32.xlu0 %v1159_v3, %s2267_s8 }
0x2122   :  { %v1162_v4 = vpop.permute.xlu0 %1161 }
0x2123   :  { %2068 = vmatmul.mubr.msk.bf16.vlgmr.msra.gmra.mrb[32].mxu1 %vm155_vm2, %v1162_v4 }
0x2124   :  { %2080 = vmatpush3.bf16.msra.mxu1 %v2486_v57  ;;  %2083 = vmatprep.mubr.msk.bf16.mxu1 %vm2265_vm0, %v2264_v0 }
0x2125   :  { %2081 = vmatprep.subr.bf16.mxu1 %v2264_v0 }
0x2128   :  { %2082 = vmatpush3.bf16.msra.mxu1 %v2490_v49 }
0x2129   :  { %2095 = vmatprep.subr.bf16.mxu1 %v2264_v0 }
0x21f6   :  { %v1200_v61 = vpop.f32.mrb[32].mxu1 }
0x21f7   :  { %v1206_v5 = vadd.f32 %v1200_v61, %v803_v11  ;;  %v2069_v6 = vpop.f32.mrb[33].mxu1 }
0x21f8   :  { %v1203_v7 = vpop.f32.mrb[34].mxu1 }
0x21f9   :  { %2209 = vtanh.f32 %v1206_v5  ;;  %v2070_v8 = vpop.f32.mrb[35].mxu1 }
0x2203   :  { %v2210_v13 = vpop.eup %2209 }
0x2204   :  { %1212 = vrot.lane.b32.xlu1 %v2210_v13, %s2262_s22  ;;  %v1208_v57 = vmul.f32 0.5, %v2210_v13 }
0x2206   :  { %v1209_v14 = vadd.f32 0.5, %v1208_v57 }
0x2208   :  { %v1210_v49 = vmul.f32 %v1209_v14, %v1152_v51  ;;  %v2152_v51 = vld [vmem:[#allocation2 + $0x50] sm:$0xff]  }
0x2276   :  { %v1213_v16 = vpop.permute.xlu1 %1212 }
0x2277   :  { %v1215_v2 = vmul.f32 %v1213_v16, %v1209_v14 }
0x2279   :  { %1217 = vrot.lane.b32.xlu0 %v1215_v2, %s2267_s8 }
0x22eb   :  { %v1218_v17 = vpop.permute.xlu0 %1217 }
0x22ec   :  { %v1220_v18 = vadd.f32 %v1218_v17, %v1210_v49 }
0x22ee   :  { %2211 = vtanh.f32 %v1220_v18 }
0x22f8   :  { %v2212_v60 = vpop.eup %2211 }
0x22f9   :  { %1223 = vrot.lane.b32.xlu1 %v2212_v60, %s2262_s22 }
0x236b   :  { %v1224_v56 = vpop.permute.xlu1 %1223 }
0x236c   :  { %v1226_v19 = vmul.f32 %v1224_v56, %v1209_v14 }
0x236e   :  { %v1227_v9 = vpack.c.bf16 %v1226_v19, %v1226_v19 }
0x2370   :  { %1229 = vrot.lane.b32.xlu0 %v1227_v9, %s2267_s8 }
0x23e2   :  { %v1230_v20 = vpop.permute.xlu0 %1229 }
0x23e3   :  { %2076 = vmatmul.mubr.msk.bf16.vlgmr.msra.gmra.mrb[36].mxu0 %vm155_vm2, %v1230_v20 }
0x23e4   :  { %2091 = vmatprep.mubr.msk.bf16.mxu0 %vm2265_vm0, %v2264_v0  ;;  %2088 = vmatpush3.bf16.msra.mxu0 %v2149_v55 }
0x23e5   :  { %2089 = vmatprep.subr.bf16.mxu0 %v2264_v0 }
0x23e8   :  { %2090 = vmatpush3.bf16.msra.mxu0 %v2151_v41 }
0x23e9   :  { %2103 = vmatprep.subr.bf16.mxu0 %v2264_v0 }
0x24b6   :  { %v1268_v62 = vpop.f32.mrb[36].mxu0 }
0x24b7   :  { %v1274_v21 = vadd.f32 %v1268_v62, %v808_v12  ;;  %v2077_v24 = vpop.f32.mrb[37].mxu0 }
0x24b8   :  { %v1271_v25 = vpop.f32.mrb[38].mxu0 }
0x24b9   :  { %2213 = vtanh.f32 %v1274_v21  ;;  %v2078_v26 = vpop.f32.mrb[39].mxu0 }
0x24c3   :  { %v2214_v27 = vpop.eup %2213 }
0x24c4   :  { %1280 = vrot.lane.b32.xlu1 %v2214_v27, %s2262_s22  ;;  %v1276_v28 = vmul.f32 0.5, %v2214_v27 }
0x24c6   :  { %v1277_v29 = vadd.f32 0.5, %v1276_v28 }
0x24c8   :  { %v1278_v33 = vmul.f32 %v1277_v29, %v1220_v18 }
0x2536   :  { %v1281_v30 = vpop.permute.xlu1 %1280 }
0x2537   :  { %v1283_v31 = vmul.f32 %v1281_v30, %v1277_v29 }
0x2539   :  { %1285 = vrot.lane.b32.xlu0 %v1283_v31, %s2267_s8 }
0x25ab   :  { %v1286_v34 = vpop.permute.xlu0 %1285 }
0x25ac   :  { %v1288_v35 = vadd.f32 %v1286_v34, %v1278_v33 }
0x25ae   :  { %2215 = vtanh.f32 %v1288_v35 }
0x25b8   :  { %v2216_v45 = vpop.eup %2215 }
0x25b9   :  { %1291 = vrot.lane.b32.xlu1 %v2216_v45, %s2262_s22 }
0x262b   :  { %v1292_v36 = vpop.permute.xlu1 %1291 }
0x262c   :  { %v1294_v63 = vmul.f32 %v1292_v36, %v1277_v29 }
0x262e   :  { %v1295_v37 = vpack.c.bf16 %v1294_v63, %v1294_v63 }
0x2630   :  { %1297 = vrot.lane.b32.xlu0 %v1295_v37, %s2267_s8 }
0x26a2   :  { %v1298_v38 = vpop.permute.xlu0 %1297 }
0x26a3   :  { %2084 = vmatmul.mubr.msk.bf16.vlgmr.msra.gmra.mrb[36].mxu1 %vm155_vm2, %v1298_v38  ;;  %v2153_v38 = vld [vmem:[#allocation2 + $0x58] sm:$0xff]  }
0x26a4   :  { %2099 = vmatprep.mubr.msk.bf16.mxu1 %vm2265_vm0, %v2264_v0  ;;  %2096 = vmatpush3.bf16.msra.mxu1 %v2150_v58 }
0x26a5   :  { %2097 = vmatprep.subr.bf16.mxu1 %v2264_v0 }
0x26a8   :  { %2098 = vmatpush3.bf16.msra.mxu1 %v2152_v51 }
0x26a9   :  { %2111 = vmatprep.subr.bf16.mxu1 %v2264_v0 }
0x26ab   :  { %2100 = vmatmul.mubr.bf16.vlgmr.msra.gmra.mrb[40].mxu1 %v2266_v10 }
0x26ac   :  { %2115 = vmatprep.mubr.msk.bf16.mxu1 %vm2265_vm0, %v2264_v0  ;;  %2112 = vmatpush3.bf16.msra.mxu1 %v2153_v38 }
0x26ad   :  { %2113 = vmatprep.subr.bf16.mxu1 %v2264_v0 }
0x2776   :  { %v1336_v15 = vpop.f32.mrb[36].mxu1 }
0x2777   :  { %v1342_v59 = vadd.f32 %v1336_v15, %v811_v39  ;;  %v2085_v40 = vpop.f32.mrb[37].mxu1  ;;  %v2154_v39 = vld [vmem:[#allocation2 + $0x68] sm:$0xff]   ;;  %v2155_v15 = vld [vmem:[#allocation2 + $0x60] sm:$0xff]  }
0x2778   :  { %v1339_v42 = vpop.f32.mrb[38].mxu1  ;;  %2114 = vmatpush3.bf16.msra.mxu1 %v2155_v15 }
0x2779   :  { %2217 = vtanh.f32 %v1342_v59  ;;  %v2086_v43 = vpop.f32.mrb[39].mxu1  ;;  %v2156_v59 = vld [vmem:[#allocation2 + $0x70] sm:$0xff]   ;;  %2127 = vmatprep.subr.bf16.mxu1 %v2264_v0 }
0x277e   :  { %v1482_v4 = vpop.f32.mrb[40].mxu1 }
0x277f   :  { %v2101_v11 = vpop.f32.mrb[41].mxu1 }
0x2780   :  { %v1485_v61 = vpop.f32.mrb[42].mxu1 }
0x2781   :  { %v2102_v5 = vpop.f32.mrb[43].mxu1 }
0x2783   :  { %v2218_v1 = vpop.eup %2217 }
0x2784   :  { %1348 = vrot.lane.b32.xlu1 %v2218_v1, %s2262_s22  ;;  %v1344_v23 = vmul.f32 0.5, %v2218_v1 }
0x2786   :  { %v1345_v44 = vadd.f32 0.5, %v1344_v23 }
0x2788   :  { %v1346_v48 = vmul.f32 %v1345_v44, %v1288_v35 }
0x27f6   :  { %v1349_v46 = vpop.permute.xlu1 %1348 }
0x27f7   :  { %v1351_v47 = vmul.f32 %v1349_v46, %v1345_v44 }
0x27f9   :  { %1353 = vrot.lane.b32.xlu0 %v1351_v47, %s2267_s8 }
0x286b   :  { %v1354_v50 = vpop.permute.xlu0 %1353 }
0x286c   :  { %v1356_v22 = vadd.f32 %v1354_v50, %v1346_v48 }
0x286e   :  { %2219 = vtanh.f32 %v1356_v22 }
0x2878   :  { %v2220_v52 = vpop.eup %2219 }
0x2879   :  { %1359 = vrot.lane.b32.xlu1 %v2220_v52, %s2262_s22 }
0x28eb   :  { %v1360_v53 = vpop.permute.xlu1 %1359 }
0x28ec   :  { %v1362_v54 = vmul.f32 %v1360_v53, %v1345_v44 }
0x28ee   :  { %v1372_v3 = vpack.c.bf16 %v1362_v54, %v2543_v32  ;;  %v1845_v32 = vld [vmem:[%s2689_s2 + $0x2] ss:$0 sm:$0xff] }
0x28f0   :  { %1378 = vrot.lane.b32.xlu0 %v1372_v3, %s2267_s8 }
0x2962   :  { %v1379_v6 = vpop.permute.xlu0 %1378 }
0x2963   :  { %2092 = vmatmul.mubr.msk.bf16.vlgmr.msra.gmra.mrb[40].mxu0 %vm155_vm2, %v1379_v6 }
0x2964   :  { %2104 = vmatpush3.bf16.msra.mxu0 %v2150_v58  ;;  %2107 = vmatprep.mubr.msk.bf16.mxu0 %vm2265_vm0, %v2264_v0 }
0x2965   :  { %2105 = vmatprep.subr.bf16.mxu0 %v2264_v0 }
0x2968   :  { %2106 = vmatpush3.bf16.msra.mxu0 %v2152_v51 }
0x2969   :  { %2119 = vmatprep.subr.bf16.mxu0 %v2264_v0 }
0x2a36   :  { %v1429_v7 = vpop.f32.mrb[40].mxu0 }
0x2a37   :  { %v1430_v8 = vadd.f32 %v1845_v32, %v1429_v7  ;;  %v2093_v13 = vpop.f32.mrb[41].mxu0 }
0x2a38   :  { %v1432_v57 = vpop.f32.mrb[42].mxu0 }
0x2a39   :  { %v1488_v14 = vadd.f32 %v1482_v4, %v1430_v8  ;;  %v1433_v16 = vadd.f32 %v1845_v32, %v1432_v57  ;;  %v2094_v2 = vpop.f32.mrb[43].mxu0 }
0x2a3b   :  { %2221 = vtanh.f32 %v1488_v14 }
0x2a45   :  { %v2222_v49 = vpop.eup %2221 }
0x2a46   :  { %1494 = vrot.lane.b32.xlu1 %v2222_v49, %s2262_s22  ;;  %v1490_v17 = vmul.f32 0.5, %v2222_v49 }
0x2a48   :  { %v1491_v18 = vadd.f32 0.5, %v1490_v17 }
0x2a4a   :  { %v1492_v19 = vmul.f32 0.0, %v1491_v18 }
0x2ab8   :  { %v1495_v60 = vpop.permute.xlu1 %1494 }
0x2ab9   :  { %v1497_v56 = vmul.f32 %v1495_v60, %v1491_v18 }
0x2abb   :  { %1499 = vrot.lane.b32.xlu0 %v1497_v56, %s2267_s8 }
0x2b2d   :  { %v1500_v9 = vpop.permute.xlu0 %1499 }
0x2b2e   :  { %v1502_v20 = vadd.f32 %v1500_v9, %v1492_v19 }
0x2b30   :  { %2223 = vtanh.f32 %v1502_v20 }
0x2b3a   :  { %v2224_v12 = vpop.eup %2223 }
0x2b3b   :  { %1505 = vrot.lane.b32.xlu1 %v2224_v12, %s2262_s22 }
0x2bad   :  { %v1506_v62 = vpop.permute.xlu1 %1505 }
0x2bae   :  { %v1508_v21 = vmul.f32 %v1506_v62, %v1491_v18 }
0x2bb0   :  { %v1509_v24 = vpack.c.bf16 %v1508_v21, %v1508_v21 }
0x2bb2   :  { %1511 = vrot.lane.b32.xlu0 %v1509_v24, %s2267_s8 }
0x2c24   :  { %v1512_v25 = vpop.permute.xlu0 %1511 }
0x2c25   :  { %2108 = vmatmul.mubr.msk.bf16.vlgmr.msra.gmra.mrb[44].mxu0 %vm155_vm2, %v1512_v25 }
0x2c26   :  { %2123 = vmatprep.mubr.msk.bf16.mxu0 %vm2265_vm0, %v2264_v0  ;;  %2120 = vmatpush3.bf16.msra.mxu0 %v2154_v39 }
0x2c27   :  { %2121 = vmatprep.subr.bf16.mxu0 %v2264_v0 }
0x2c2a   :  { %2122 = vmatpush3.bf16.msra.mxu0 %v2156_v59 }
0x2c2d   :  { %2124 = vmatmul.mubr.bf16.vlgmr.msra.gmra.mrb[48].mxu0 %v2266_v10  ;;  %v1852_v10 = vld [vmem:[%s2689_s2 + $0x3] ss:$0 sm:$0xff] }
0x2cf8   :  { %v1550_v26 = vpop.f32.mrb[44].mxu0 }
0x2cf9   :  { %v1556_v27 = vadd.f32 %v1550_v26, %v1433_v16  ;;  %v2109_v28 = vpop.f32.mrb[45].mxu0 }
0x2cfa   :  { %v1553_v29 = vpop.f32.mrb[46].mxu0 }
0x2cfb   :  { %2225 = vtanh.f32 %v1556_v27  ;;  %v2110_v30 = vpop.f32.mrb[47].mxu0 }
0x2d00   :  { %v1696_v23 = vpop.f32.mrb[48].mxu0 }
0x2d01   :  { %v2125_v44 = vpop.f32.mrb[49].mxu0 }
0x2d02   :  { %v1699_v46 = vpop.f32.mrb[50].mxu0 }
0x2d03   :  { %v2126_v47 = vpop.f32.mrb[51].mxu0 }
0x2d05   :  { %v2226_v31 = vpop.eup %2225 }
0x2d06   :  { %1562 = vrot.lane.b32.xlu1 %v2226_v31, %s2262_s22  ;;  %v1558_v33 = vmul.f32 0.5, %v2226_v31 }
0x2d08   :  { %v1559_v34 = vadd.f32 0.5, %v1558_v33 }
0x2d0a   :  { %v1560_v36 = vmul.f32 %v1559_v34, %v1502_v20 }
0x2d78   :  { %v1563_v35 = vpop.permute.xlu1 %1562 }
0x2d79   :  { %v1565_v45 = vmul.f32 %v1563_v35, %v1559_v34 }
0x2d7b   :  { %1567 = vrot.lane.b32.xlu0 %v1565_v45, %s2267_s8 }
0x2ded   :  { %v1568_v63 = vpop.permute.xlu0 %1567 }
0x2dee   :  { %v1570_v37 = vadd.f32 %v1568_v63, %v1560_v36 }
0x2df0   :  { %2227 = vtanh.f32 %v1570_v37 }
0x2dfa   :  { %v2228_v40 = vpop.eup %2227 }
0x2dfb   :  { %1573 = vrot.lane.b32.xlu1 %v2228_v40, %s2262_s22 }
0x2e6d   :  { %v1574_v42 = vpop.permute.xlu1 %1573 }
0x2e6e   :  { %v1576_v43 = vmul.f32 %v1574_v42, %v1559_v34 }
0x2e70   :  { %v1586_v1 = vpack.c.bf16 %v1576_v43, %v1508_v21 }
0x2e72   :  { %1592 = vrot.lane.b32.xlu0 %v1586_v1, %s2267_s8 }
0x2ee4   :  { %v1593_v48 = vpop.permute.xlu0 %1592 }
0x2ee5   :  { %2116 = vmatmul.mubr.msk.bf16.vlgmr.msra.gmra.mrb[44].mxu1 %vm155_vm2, %v1593_v48 }
0x2ee6   :  { %2128 = vmatpush3.bf16.msra.mxu1 %v2154_v39  ;;  %2131 = vmatprep.mubr.msk.bf16.mxu1 %vm2265_vm0, %v2264_v0 }
0x2ee7   :  { %2129 = vmatprep.subr.bf16.mxu1 %v2264_v0 }
0x2eea   :  { %2130 = vmatpush3.bf16.msra.mxu1 %v2156_v59 }
0x2fb8   :  { %v1643_v50 = vpop.f32.mrb[44].mxu1 }
0x2fb9   :  { %v1644_v22 = vadd.f32 %v1852_v10, %v1643_v50  ;;  %v2117_v55 = vpop.f32.mrb[45].mxu1 }
0x2fba   :  { %v1646_v58 = vpop.f32.mrb[46].mxu1 }
0x2fbb   :  { %v1702_v41 = vadd.f32 %v1696_v23, %v1644_v22  ;;  %v1647_v51 = vadd.f32 %v1852_v10, %v1646_v58  ;;  %v2118_v52 = vpop.f32.mrb[47].mxu1 }
0x2fbd   :  { %2229 = vtanh.f32 %v1702_v41 }
0x2fc7   :  { %v2230_v53 = vpop.eup %2229 }
0x2fc8   :  { %1708 = vrot.lane.b32.xlu1 %v2230_v53, %s2262_s22  ;;  %v1704_v54 = vmul.f32 0.5, %v2230_v53 }
0x2fca   :  { %v1705_v3 = vadd.f32 0.5, %v1704_v54 }
0x2fcc   :  { %v1706_v11 = vmul.f32 0.0, %v1705_v3 }
0x303a   :  { %v1709_v4 = vpop.permute.xlu1 %1708 }
0x303b   :  { %v1711_v0 = vmul.f32 %v1709_v4, %v1705_v3 }
0x303d   :  { %1713 = vrot.lane.b32.xlu0 %v1711_v0, %s2267_s8 }
0x30af   :  { %v1714_v61 = vpop.permute.xlu0 %1713 }
0x30b0   :  { %v1716_v5 = vadd.f32 %v1714_v61, %v1706_v11 }
0x30b2   :  { %2231 = vtanh.f32 %v1716_v5 }
0x30bc   :  { %v2232_v6 = vpop.eup %2231 }
0x30bd   :  { %1719 = vrot.lane.b32.xlu1 %v2232_v6, %s2262_s22 }
0x312f   :  { %v1720_v32 = vpop.permute.xlu1 %1719 }
0x3130   :  { %v1722_v7 = vmul.f32 %v1720_v32, %v1705_v3 }
0x3132   :  { %v1723_v8 = vpack.c.bf16 %v1722_v7, %v1722_v7 }
0x3134   :  { %1725 = vrot.lane.b32.xlu0 %v1723_v8, %s2267_s8 }
0x31a6   :  { %v1726_v13 = vpop.permute.xlu0 %1725 }
0x31a7   :  { %2132 = vmatmul.mubr.msk.bf16.vlgmr.msra.gmra.mrb[48].mxu1 %vm155_vm2, %v1726_v13 }
0x327a   :  { %v1764_v57 = vpop.f32.mrb[48].mxu1 }
0x327b   :  { %v1770_v14 = vadd.f32 %v1764_v57, %v1647_v51  ;;  %v2133_v16 = vpop.f32.mrb[49].mxu1 }
0x327c   :  { %v1767_v2 = vpop.f32.mrb[50].mxu1 }
0x327d   :  { %2233 = vtanh.f32 %v1770_v14  ;;  %v2134_v49 = vpop.f32.mrb[51].mxu1 }
0x3287   :  { %v2234_v17 = vpop.eup %2233 }
0x3288   :  { %1776 = vrot.lane.b32.xlu1 %v2234_v17, %s2262_s22  ;;  %v1772_v18 = vmul.f32 0.5, %v2234_v17 }
0x328a   :  { %v1773_v60 = vadd.f32 0.5, %v1772_v18 }
0x328c   :  { %v1774_v9 = vmul.f32 %v1773_v60, %v1716_v5 }
0x32fa   :  { %v1777_v56 = vpop.permute.xlu1 %1776 }
0x32fb   :  { %v1779_v19 = vmul.f32 %v1777_v56, %v1773_v60 }
0x32fd   :  { %1781 = vrot.lane.b32.xlu0 %v1779_v19, %s2267_s8 }
0x3301   :  { %1792 = vrot.lane.b32.xlu0 %v1722_v7, %s2267_s8 }
0x336f   :  { %v1782_v20 = vpop.permute.xlu0 %1781 }
0x3370   :  { %v1784_v12 = vadd.f32 %v1782_v20, %v1774_v9 }
0x3372   :  { %2235 = vtanh.f32 %v1784_v12 }
0x3373   :  { %v1793_v62 = vpop.permute.xlu0 %1792 }
0x3374   :  { %1795 = vst.msk [vmem:[%s2690_s3] sm:$0xff] %vm155_vm2, %v1793_v62 }
0x337c   :  { %v2236_v21 = vpop.eup %2235 }
0x337d   :  { %1787 = vrot.lane.b32.xlu1 %v2236_v21, %s2262_s22 }
0x33ef   :  { %v1788_v24 = vpop.permute.xlu1 %1787 }
0x33f0   :  { %v1790_v25 = vmul.f32 %v1788_v24, %v1773_v60 }
0x33f2   :  { %1797 = vrot.lane.b32.xlu1 %v1790_v25, %s2267_s8 }
0x3464   :  { %v1798_v26 = vpop.permute.xlu1 %1797 }
0x3465   :  { %1859 = vst.msk [vmem:[%s2690_s3 + $0x8] sm:$0xff] %vm155_vm2, %v1798_v26 }
0x3466   :  { %1806 = vsyncpa [#allocation3], 1 }

</bundles_post_ra>
